<compile_context>
chip_gen: v7x
topology: tpu7x:2x2x1
jax: 0.10.0
libtpu: 0.0.40
codegen_flags: <defaults>
</compile_context>

<pallas_src>
import jax
import jax.numpy as jnp
from jax.experimental import pallas as pl
from jax.experimental.pallas import tpu as pltpu


_VMEM_LIMIT = 32 * 1024 * 1024  # conservative, fits v5e/v6e/v7x scoped VMEM


def _round_up(x, m):
    return -(-x // m) * m


# ----------------------------- Pallas kernels ------------------------------

def _mm_relu_kernel(x_ref, w_ref, o_ref):
    # (TM, K) bf16 x (K, N) bf16 -> f32 accumulate on MXU, ReLU, store bf16.
    acc = jnp.dot(x_ref[...], w_ref[...], preferred_element_type=jnp.float32)
    o_ref[...] = jnp.maximum(acc, 0.0).astype(o_ref.dtype)


def _fc_fused_kernel(x_ref, w1_ref, b1_ref, w2_ref, b2_ref, w3_ref, b3_ref,
                     o_ref):
    # fc1 -> fc2 -> fc3 (Linear + bias, no activation, matching the reference).
    h1 = jnp.dot(x_ref[...], w1_ref[...],
                 preferred_element_type=jnp.float32) + b1_ref[...]
    h2 = jnp.dot(h1.astype(jnp.bfloat16), w2_ref[...],
                 preferred_element_type=jnp.float32) + b2_ref[...]
    o_ref[...] = jnp.dot(h2.astype(jnp.bfloat16), w3_ref[...],
                         preferred_element_type=jnp.float32) + b3_ref[...]


# ----------------------------- kernel wrappers ------------------------------

def matmul_relu(x, w, *, tm=512):
    """ReLU(x @ w). x: (M, K) float, w: (K, N) bf16 (pre-packed). -> (M, N) bf16."""
    M, K = x.shape
    Kw, N = w.shape
    assert K == Kw, (K, Kw)
    TM = min(tm, _round_up(M, 8))
    Mp = _round_up(M, TM)
    xb = jnp.pad(x.astype(jnp.bfloat16), ((0, Mp - M), (0, 0)))
    out = pl.pallas_call(
        _mm_relu_kernel,
        out_shape=jax.ShapeDtypeStruct((Mp, N), jnp.bfloat16),
        grid=(Mp // TM,),
        in_specs=[
            pl.BlockSpec((TM, K), lambda i: (i, 0)),   # activation rows, tiled
            pl.BlockSpec((K, N), lambda i: (0, 0)),    # weight, resident
        ],
        out_specs=pl.BlockSpec((TM, N), lambda i: (i, 0)),
        compiler_params=pltpu.CompilerParams(
            dimension_semantics=("parallel",),
            vmem_limit_bytes=_VMEM_LIMIT,
        ),
    )(xb, w)
    return out[:M]


def fc_head(x, p, *, tm=512):
    """Fused fc1->fc2->fc3 head. x: (B, 256). Returns (B, 1) float32."""
    B, K = x.shape
    TM = min(tm, _round_up(B, 8))
    Bp = _round_up(B, TM)
    xb = jnp.pad(x.astype(jnp.bfloat16), ((0, Bp - B), (0, 0)))
    w1, b1 = p["fc1_w"], p["fc1_b"]
    w2, b2 = p["fc2_w"], p["fc2_b"]
    w3, b3 = p["fc3_w"], p["fc3_b"]
    NP = w3.shape[1]                                   # 128 (lane-dense fc3)
    out = pl.pallas_call(
        _fc_fused_kernel,
        out_shape=jax.ShapeDtypeStruct((Bp, NP), jnp.float32),
        grid=(Bp // TM,),
        in_specs=[
            pl.BlockSpec((TM, K), lambda i: (i, 0)),
            pl.BlockSpec(w1.shape, lambda i: (0, 0)),
            pl.BlockSpec(b1.shape, lambda i: (0, 0)),
            pl.BlockSpec(w2.shape, lambda i: (0, 0)),
            pl.BlockSpec(b2.shape, lambda i: (0, 0)),
            pl.BlockSpec(w3.shape, lambda i: (0, 0)),
            pl.BlockSpec(b3.shape, lambda i: (0, 0)),
        ],
        out_specs=pl.BlockSpec((TM, NP), lambda i: (i, 0)),
        compiler_params=pltpu.CompilerParams(
            dimension_semantics=("parallel",),
            vmem_limit_bytes=_VMEM_LIMIT,
        ),
    )(xb, w1, b1, w2, b2, w3, b3)
    return out[:B, :1]


# ------------------------------ conv via im2col -----------------------------

def conv2d_relu_nhwc(x, wmat, *, kh, kw, stride, pad):
    """Conv2d(bias=False) + ReLU in NHWC.
    x: (B, H, W, C); wmat: (kh*kw*C, OC) bf16 pre-packed. -> (B, OH, OW, OC) bf16."""
    B, H, W, C = x.shape
    xp = jnp.pad(x, ((0, 0), (pad, pad), (pad, pad), (0, 0)))
    Hp, Wp = H + 2 * pad, W + 2 * pad
    OH = (Hp - kh) // stride + 1
    OW = (Wp - kw) // stride + 1
    # TODO(synk): fold this im2col into the Pallas kernel (implicit GEMM via a
    # K grid axis / manual DMA) so the (kh*kw)x-inflated cols matrix never
    # round-trips HBM at large batch.
    patches = [
        xp[:, i:i + stride * OH:stride, j:j + stride * OW:stride, :]
        for i in range(kh) for j in range(kw)
    ]
    cols = jnp.concatenate(patches, axis=-1).reshape(B * OH * OW, kh * kw * C)
    out = matmul_relu(cols, wmat)                      # (B*OH*OW, OC) bf16
    return out.reshape(B, OH, OW, wmat.shape[1])       # already NHWC


# ------------------------------ parameters ---------------------------------

def _xavier_uniform(key, out_dim, in_dim):
    bound = float(jnp.sqrt(6.0 / (in_dim + out_dim)))
    return jax.random.uniform(key, (out_dim, in_dim), jnp.float32, -bound, bound)


def _conv_init(key, oc, ic, k):
    bound = 1.0 / float(jnp.sqrt(ic * k * k))
    return jax.random.uniform(key, (oc, ic, k, k), jnp.float32, -bound, bound)


def init_params(key):
    """PyTorch-layout params (conv: (OC,C,KH,KW) no bias; linear: (out,in)+bias)."""
    ks = jax.random.split(key, 7)
    return {
        "conv0_w": _conv_init(ks[0], 32, 1, 5),
        "conv1_w": _conv_init(ks[1], 32, 32, 4),
        "conv2_w": _conv_init(ks[2], 32, 32, 5),
        "conv3_w": _conv_init(ks[3], 64, 32, 5),
        "fc1_w": _xavier_uniform(ks[4], 256, 256),     # num_feature = 64*4*1
        "fc1_b": jnp.zeros((256,), jnp.float32),
        "fc2_w": _xavier_uniform(ks[5], 256, 256),
        "fc2_b": jnp.zeros((256,), jnp.float32),
        "fc3_w": _xavier_uniform(ks[6], 1, 256),
        "fc3_b": jnp.zeros((1,), jnp.float32),
    }


def _pack_conv(w):
    # (OC, C, KH, KW) -> (KH*KW*C, OC) to match the [kh, kw, c] im2col order.
    oc, c, kh, kw = w.shape
    return w.transpose(2, 3, 1, 0).reshape(kh * kw * c, oc).astype(jnp.bfloat16)


def pack_params(p):
    """One-time weight packing (outside the per-call path)."""
    # fc1 consumes the flattened conv3 output.  PyTorch flattens NCHW
    # (index = c*H*W + h*W + w); we flatten NHWC (index = h*W*C + w*C + c),
    # so permute fc1's input rows accordingly (C=64, H=4, W=1).
    fc1 = p["fc1_w"].reshape(256, 64, 4, 1).transpose(2, 3, 1, 0).reshape(256, 256)
    fc3 = jnp.pad(p["fc3_w"].T, ((0, 0), (0, 127)))            # (256, 128)
    b3 = jnp.pad(p["fc3_b"].reshape(1, 1), ((0, 0), (0, 127)))  # (1, 128)
    return {
        "conv0_w": _pack_conv(p["conv0_w"]),
        "conv1_w": _pack_conv(p["conv1_w"]),
        "conv2_w": _pack_conv(p["conv2_w"]),
        "conv3_w": _pack_conv(p["conv3_w"]),
        "fc1_w": fc1.astype(jnp.bfloat16),
        "fc1_b": p["fc1_b"].reshape(1, 256).astype(jnp.float32),
        "fc2_w": p["fc2_w"].T.astype(jnp.bfloat16),
        "fc2_b": p["fc2_b"].reshape(1, 256).astype(jnp.float32),
        "fc3_w": fc3.astype(jnp.bfloat16),
        "fc3_b": b3.astype(jnp.float32),
    }


# ------------------------------- forward -----------------------------------

@jax.jit
def forward(packed, x):
    """x: (B, 1, 22, 10) NCHW float32 (PyTorch layout). Returns (B, 1) float32."""
    x = x.transpose(0, 2, 3, 1).astype(jnp.bfloat16)                       # NHWC once
    x = conv2d_relu_nhwc(x, packed["conv0_w"], kh=5, kw=5, stride=1, pad=2)  # (B,22,10,32)
    x = conv2d_relu_nhwc(x, packed["conv1_w"], kh=4, kw=4, stride=2, pad=1)  # (B,11, 5,32)
    x = conv2d_relu_nhwc(x, packed["conv2_w"], kh=5, kw=5, stride=1, pad=2)  # (B,11, 5,32)
    x = conv2d_relu_nhwc(x, packed["conv3_w"], kh=5, kw=5, stride=2, pad=0)  # (B, 4, 1,64)
    B = x.shape[0]
    x = x.reshape(B, 4 * 1 * 64)          # NHWC flatten; fc1 rows pre-permuted to match
    return fc_head(x, packed)             # (B, 1) float32


if __name__ == "__main__":
    key = jax.random.PRNGKey(0)
    params = init_params(key)
    packed = pack_params(params)
    x = jax.random.normal(jax.random.fold_in(key, 99), (2, 1, 22, 10), jnp.float32)
    y = forward(packed, x)
    jax.block_until_ready(y)
    assert y.shape == (2, 1), y.shape
    assert bool(jnp.all(jnp.isfinite(y)))
    print("KERNEL_OK")
</pallas_src>

<mosaic_0001>
module attributes {stable_mosaic.version = 11 : i64} {
  func.func @_mm_relu_kernel(%arg0: i32, %arg1: memref<440x25xbf16, #tpu.memory_space<vmem>>, %arg2: memref<25x32xbf16, #tpu.memory_space<vmem>>, %arg3: memref<440x32xbf16, #tpu.memory_space<vmem>>) attributes {dimension_semantics = [#tpu.dimension_semantics<parallel>], iteration_bounds = array<i64: 1>, scalar_prefetch = 0 : i64, scratch_operands = 0 : i64, tpu.core_type = #tpu.core_type<tc>, window_params = [{transform_indices = @transform_0, window_bounds = array<i64: 440, 25>}, {pipeline_mode = #tpu.pipeline_mode<synchronous>, transform_indices = @transform_1, window_bounds = array<i64: 25, 32>}, {transform_indices = @transform_2, window_bounds = array<i64: 440, 32>}]} {
    %c0 = arith.constant 0 : index
    %c0_0 = arith.constant 0 : index
    %0 = vector.load %arg1[%c0, %c0_0] : memref<440x25xbf16, #tpu.memory_space<vmem>>, vector<440x25xbf16>
    %c0_1 = arith.constant 0 : index
    %c0_2 = arith.constant 0 : index
    %1 = vector.load %arg2[%c0_1, %c0_2] : memref<25x32xbf16, #tpu.memory_space<vmem>>, vector<25x32xbf16>
    %cst = arith.constant dense<0.000000e+00> : vector<440x32xf32>
    %2 = tpu.matmul %0, %1, %cst {dimension_numbers = #tpu.dot_dimension_numbers<[1], [0], [0], [1], [0, 0, 1, 1], [], []>} : vector<440x25xbf16>, vector<25x32xbf16>, vector<440x32xf32> -> vector<440x32xf32>
    %cst_3 = arith.constant 0.000000e+00 : f32
    %3 = vector.broadcast %cst_3 : f32 to vector<440x32xf32>
    %4 = arith.maximumf %2, %3 : vector<440x32xf32>
    %5 = arith.truncf %4 : vector<440x32xf32> to vector<440x32xbf16>
    %c0_4 = arith.constant 0 : index
    %c0_5 = arith.constant 0 : index
    %6 = vector.load %arg3[%c0_4, %c0_5] : memref<440x32xbf16, #tpu.memory_space<vmem>>, vector<440x32xbf16>
    tpu.vector_store %arg3[%c0_4, %c0_5], %5 {strides = array<i32>} : memref<440x32xbf16, #tpu.memory_space<vmem>>, vector<440x32xbf16>,
    return
  }
  func.func @transform_0(%arg0: i32) -> (i32, i32) {
    %c0_i32 = arith.constant 0 : i32
    %c0_i32_0 = arith.constant 0 : i32
    return %arg0, %c0_i32 : i32, i32
  }
  func.func @transform_1(%arg0: i32) -> (i32, i32) {
    %c0_i32 = arith.constant 0 : i32
    %c0_i32_0 = arith.constant 0 : i32
    %c0_i32_1 = arith.constant 0 : i32
    return %c0_i32, %c0_i32_0 : i32, i32
  }
  func.func @transform_2(%arg0: i32) -> (i32, i32) {
    %c0_i32 = arith.constant 0 : i32
    %c0_i32_0 = arith.constant 0 : i32
    return %arg0, %c0_i32 : i32, i32
  }
}

module attributes {stable_mosaic.version = 11 : i64} {
  func.func @_mm_relu_kernel(%arg0: i32, %arg1: memref<112x512xbf16, #tpu.memory_space<vmem>>, %arg2: memref<512x32xbf16, #tpu.memory_space<vmem>>, %arg3: memref<112x32xbf16, #tpu.memory_space<vmem>>) attributes {dimension_semantics = [#tpu.dimension_semantics<parallel>], iteration_bounds = array<i64: 1>, scalar_prefetch = 0 : i64, scratch_operands = 0 : i64, tpu.core_type = #tpu.core_type<tc>, window_params = [{transform_indices = @transform_0, window_bounds = array<i64: 112, 512>}, {pipeline_mode = #tpu.pipeline_mode<synchronous>, transform_indices = @transform_1, window_bounds = array<i64: 512, 32>}, {transform_indices = @transform_2, window_bounds = array<i64: 112, 32>}]} {
    %c0 = arith.constant 0 : index
    %c0_0 = arith.constant 0 : index
    %0 = vector.load %arg1[%c0, %c0_0] : memref<112x512xbf16, #tpu.memory_space<vmem>>, vector<112x512xbf16>
    %c0_1 = arith.constant 0 : index
    %c0_2 = arith.constant 0 : index
    %1 = vector.load %arg2[%c0_1, %c0_2] : memref<512x32xbf16, #tpu.memory_space<vmem>>, vector<512x32xbf16>
    %cst = arith.constant dense<0.000000e+00> : vector<112x32xf32>
    %2 = tpu.matmul %0, %1, %cst {dimension_numbers = #tpu.dot_dimension_numbers<[1], [0], [0], [1], [0, 0, 1, 1], [], []>} : vector<112x512xbf16>, vector<512x32xbf16>, vector<112x32xf32> -> vector<112x32xf32>
    %cst_3 = arith.constant 0.000000e+00 : f32
    %3 = vector.broadcast %cst_3 : f32 to vector<112x32xf32>
    %4 = arith.maximumf %2, %3 : vector<112x32xf32>
    %5 = arith.truncf %4 : vector<112x32xf32> to vector<112x32xbf16>
    %c0_4 = arith.constant 0 : index
    %c0_5 = arith.constant 0 : index
    %6 = vector.load %arg3[%c0_4, %c0_5] : memref<112x32xbf16, #tpu.memory_space<vmem>>, vector<112x32xbf16>
    tpu.vector_store %arg3[%c0_4, %c0_5], %5 {strides = array<i32>} : memref<112x32xbf16, #tpu.memory_space<vmem>>, vector<112x32xbf16>,
    return
  }
  func.func @transform_0(%arg0: i32) -> (i32, i32) {
    %c0_i32 = arith.constant 0 : i32
    %c0_i32_0 = arith.constant 0 : i32
    return %arg0, %c0_i32 : i32, i32
  }
  func.func @transform_1(%arg0: i32) -> (i32, i32) {
    %c0_i32 = arith.constant 0 : i32
    %c0_i32_0 = arith.constant 0 : i32
    %c0_i32_1 = arith.constant 0 : i32
    return %c0_i32, %c0_i32_0 : i32, i32
  }
  func.func @transform_2(%arg0: i32) -> (i32, i32) {
    %c0_i32 = arith.constant 0 : i32
    %c0_i32_0 = arith.constant 0 : i32
    return %arg0, %c0_i32 : i32, i32
  }
}

module attributes {stable_mosaic.version = 11 : i64} {
  func.func @_mm_relu_kernel(%arg0: i32, %arg1: memref<112x800xbf16, #tpu.memory_space<vmem>>, %arg2: memref<800x32xbf16, #tpu.memory_space<vmem>>, %arg3: memref<112x32xbf16, #tpu.memory_space<vmem>>) attributes {dimension_semantics = [#tpu.dimension_semantics<parallel>], iteration_bounds = array<i64: 1>, scalar_prefetch = 0 : i64, scratch_operands = 0 : i64, tpu.core_type = #tpu.core_type<tc>, window_params = [{transform_indices = @transform_0, window_bounds = array<i64: 112, 800>}, {pipeline_mode = #tpu.pipeline_mode<synchronous>, transform_indices = @transform_1, window_bounds = array<i64: 800, 32>}, {transform_indices = @transform_2, window_bounds = array<i64: 112, 32>}]} {
    %c0 = arith.constant 0 : index
    %c0_0 = arith.constant 0 : index
    %0 = vector.load %arg1[%c0, %c0_0] : memref<112x800xbf16, #tpu.memory_space<vmem>>, vector<112x800xbf16>
    %c0_1 = arith.constant 0 : index
    %c0_2 = arith.constant 0 : index
    %1 = vector.load %arg2[%c0_1, %c0_2] : memref<800x32xbf16, #tpu.memory_space<vmem>>, vector<800x32xbf16>
    %cst = arith.constant dense<0.000000e+00> : vector<112x32xf32>
    %2 = tpu.matmul %0, %1, %cst {dimension_numbers = #tpu.dot_dimension_numbers<[1], [0], [0], [1], [0, 0, 1, 1], [], []>} : vector<112x800xbf16>, vector<800x32xbf16>, vector<112x32xf32> -> vector<112x32xf32>
    %cst_3 = arith.constant 0.000000e+00 : f32
    %3 = vector.broadcast %cst_3 : f32 to vector<112x32xf32>
    %4 = arith.maximumf %2, %3 : vector<112x32xf32>
    %5 = arith.truncf %4 : vector<112x32xf32> to vector<112x32xbf16>
    %c0_4 = arith.constant 0 : index
    %c0_5 = arith.constant 0 : index
    %6 = vector.load %arg3[%c0_4, %c0_5] : memref<112x32xbf16, #tpu.memory_space<vmem>>, vector<112x32xbf16>
    tpu.vector_store %arg3[%c0_4, %c0_5], %5 {strides = array<i32>} : memref<112x32xbf16, #tpu.memory_space<vmem>>, vector<112x32xbf16>,
    return
  }
  func.func @transform_0(%arg0: i32) -> (i32, i32) {
    %c0_i32 = arith.constant 0 : i32
    %c0_i32_0 = arith.constant 0 : i32
    return %arg0, %c0_i32 : i32, i32
  }
  func.func @transform_1(%arg0: i32) -> (i32, i32) {
    %c0_i32 = arith.constant 0 : i32
    %c0_i32_0 = arith.constant 0 : i32
    %c0_i32_1 = arith.constant 0 : i32
    return %c0_i32, %c0_i32_0 : i32, i32
  }
  func.func @transform_2(%arg0: i32) -> (i32, i32) {
    %c0_i32 = arith.constant 0 : i32
    %c0_i32_0 = arith.constant 0 : i32
    return %arg0, %c0_i32 : i32, i32
  }
}

module attributes {stable_mosaic.version = 11 : i64} {
  func.func @_mm_relu_kernel(%arg0: i32, %arg1: memref<8x800xbf16, #tpu.memory_space<vmem>>, %arg2: memref<800x64xbf16, #tpu.memory_space<vmem>>, %arg3: memref<8x64xbf16, #tpu.memory_space<vmem>>) attributes {dimension_semantics = [#tpu.dimension_semantics<parallel>], iteration_bounds = array<i64: 1>, scalar_prefetch = 0 : i64, scratch_operands = 0 : i64, tpu.core_type = #tpu.core_type<tc>, window_params = [{transform_indices = @transform_0, window_bounds = array<i64: 8, 800>}, {pipeline_mode = #tpu.pipeline_mode<synchronous>, transform_indices = @transform_1, window_bounds = array<i64: 800, 64>}, {transform_indices = @transform_2, window_bounds = array<i64: 8, 64>}]} {
    %c0 = arith.constant 0 : index
    %c0_0 = arith.constant 0 : index
    %0 = vector.load %arg1[%c0, %c0_0] : memref<8x800xbf16, #tpu.memory_space<vmem>>, vector<8x800xbf16>
    %c0_1 = arith.constant 0 : index
    %c0_2 = arith.constant 0 : index
    %1 = vector.load %arg2[%c0_1, %c0_2] : memref<800x64xbf16, #tpu.memory_space<vmem>>, vector<800x64xbf16>
    %cst = arith.constant dense<0.000000e+00> : vector<8x64xf32>
    %2 = tpu.matmul %0, %1, %cst {dimension_numbers = #tpu.dot_dimension_numbers<[1], [0], [0], [1], [0, 0, 1, 1], [], []>} : vector<8x800xbf16>, vector<800x64xbf16>, vector<8x64xf32> -> vector<8x64xf32>
    %cst_3 = arith.constant 0.000000e+00 : f32
    %3 = vector.broadcast %cst_3 : f32 to vector<8x64xf32>
    %4 = arith.maximumf %2, %3 : vector<8x64xf32>
    %5 = arith.truncf %4 : vector<8x64xf32> to vector<8x64xbf16>
    %c0_4 = arith.constant 0 : index
    %c0_5 = arith.constant 0 : index
    %6 = vector.load %arg3[%c0_4, %c0_5] : memref<8x64xbf16, #tpu.memory_space<vmem>>, vector<8x64xbf16>
    tpu.vector_store %arg3[%c0_4, %c0_5], %5 {strides = array<i32>} : memref<8x64xbf16, #tpu.memory_space<vmem>>, vector<8x64xbf16>,
    return
  }
  func.func @transform_0(%arg0: i32) -> (i32, i32) {
    %c0_i32 = arith.constant 0 : i32
    %c0_i32_0 = arith.constant 0 : i32
    return %arg0, %c0_i32 : i32, i32
  }
  func.func @transform_1(%arg0: i32) -> (i32, i32) {
    %c0_i32 = arith.constant 0 : i32
    %c0_i32_0 = arith.constant 0 : i32
    %c0_i32_1 = arith.constant 0 : i32
    return %c0_i32, %c0_i32_0 : i32, i32
  }
  func.func @transform_2(%arg0: i32) -> (i32, i32) {
    %c0_i32 = arith.constant 0 : i32
    %c0_i32_0 = arith.constant 0 : i32
    return %arg0, %c0_i32 : i32, i32
  }
}

module attributes {stable_mosaic.version = 11 : i64} {
  func.func @_fc_fused_kernel(%arg0: i32, %arg1: memref<8x256xbf16, #tpu.memory_space<vmem>>, %arg2: memref<256x256xbf16, #tpu.memory_space<vmem>>, %arg3: memref<1x256xf32, #tpu.memory_space<vmem>>, %arg4: memref<256x256xbf16, #tpu.memory_space<vmem>>, %arg5: memref<1x256xf32, #tpu.memory_space<vmem>>, %arg6: memref<256x128xbf16, #tpu.memory_space<vmem>>, %arg7: memref<1x128xf32, #tpu.memory_space<vmem>>, %arg8: memref<8x128xf32, #tpu.memory_space<vmem>>) attributes {dimension_semantics = [#tpu.dimension_semantics<parallel>], iteration_bounds = array<i64: 1>, scalar_prefetch = 0 : i64, scratch_operands = 0 : i64, tpu.core_type = #tpu.core_type<tc>, window_params = [{transform_indices = @transform_0, window_bounds = array<i64: 8, 256>}, {pipeline_mode = #tpu.pipeline_mode<synchronous>, transform_indices = @transform_1, window_bounds = array<i64: 256, 256>}, {pipeline_mode = #tpu.pipeline_mode<synchronous>, transform_indices = @transform_2, window_bounds = array<i64: 1, 256>}, {pipeline_mode = #tpu.pipeline_mode<synchronous>, transform_indices = @transform_3, window_bounds = array<i64: 256, 256>}, {pipeline_mode = #tpu.pipeline_mode<synchronous>, transform_indices = @transform_4, window_bounds = array<i64: 1, 256>}, {pipeline_mode = #tpu.pipeline_mode<synchronous>, transform_indices = @transform_5, window_bounds = array<i64: 256, 128>}, {pipeline_mode = #tpu.pipeline_mode<synchronous>, transform_indices = @transform_6, window_bounds = array<i64: 1, 128>}, {transform_indices = @transform_7, window_bounds = array<i64: 8, 128>}]} {
    %c0 = arith.constant 0 : index
    %c0_0 = arith.constant 0 : index
    %0 = vector.load %arg1[%c0, %c0_0] : memref<8x256xbf16, #tpu.memory_space<vmem>>, vector<8x256xbf16>
    %c0_1 = arith.constant 0 : index
    %c0_2 = arith.constant 0 : index
    %1 = vector.load %arg2[%c0_1, %c0_2] : memref<256x256xbf16, #tpu.memory_space<vmem>>, vector<256x256xbf16>
    %cst = arith.constant dense<0.000000e+00> : vector<8x256xf32>
    %2 = tpu.matmul %0, %1, %cst {dimension_numbers = #tpu.dot_dimension_numbers<[1], [0], [0], [1], [0, 0, 1, 1], [], []>} : vector<8x256xbf16>, vector<256x256xbf16>, vector<8x256xf32> -> vector<8x256xf32>
    %c0_3 = arith.constant 0 : index
    %c0_4 = arith.constant 0 : index
    %3 = vector.load %arg3[%c0_3, %c0_4] : memref<1x256xf32, #tpu.memory_space<vmem>>, vector<1x256xf32>
    %4 = vector.broadcast %3 : vector<1x256xf32> to vector<8x256xf32>
    %5 = arith.addf %2, %4 : vector<8x256xf32>
    %6 = arith.truncf %5 : vector<8x256xf32> to vector<8x256xbf16>
    %c0_5 = arith.constant 0 : index
    %c0_6 = arith.constant 0 : index
    %7 = vector.load %arg4[%c0_5, %c0_6] : memref<256x256xbf16, #tpu.memory_space<vmem>>, vector<256x256xbf16>
    %cst_7 = arith.constant dense<0.000000e+00> : vector<8x256xf32>
    %8 = tpu.matmul %6, %7, %cst_7 {dimension_numbers = #tpu.dot_dimension_numbers<[1], [0], [0], [1], [0, 0, 1, 1], [], []>} : vector<8x256xbf16>, vector<256x256xbf16>, vector<8x256xf32> -> vector<8x256xf32>
    %c0_8 = arith.constant 0 : index
    %c0_9 = arith.constant 0 : index
    %9 = vector.load %arg5[%c0_8, %c0_9] : memref<1x256xf32, #tpu.memory_space<vmem>>, vector<1x256xf32>
    %10 = vector.broadcast %9 : vector<1x256xf32> to vector<8x256xf32>
    %11 = arith.addf %8, %10 : vector<8x256xf32>
    %12 = arith.truncf %11 : vector<8x256xf32> to vector<8x256xbf16>
    %c0_10 = arith.constant 0 : index
    %c0_11 = arith.constant 0 : index
    %13 = vector.load %arg6[%c0_10, %c0_11] : memref<256x128xbf16, #tpu.memory_space<vmem>>, vector<256x128xbf16>
    %cst_12 = arith.constant dense<0.000000e+00> : vector<8x128xf32>
    %14 = tpu.matmul %12, %13, %cst_12 {dimension_numbers = #tpu.dot_dimension_numbers<[1], [0], [0], [1], [0, 0, 1, 1], [], []>} : vector<8x256xbf16>, vector<256x128xbf16>, vector<8x128xf32> -> vector<8x128xf32>
    %c0_13 = arith.constant 0 : index
    %c0_14 = arith.constant 0 : index
    %15 = vector.load %arg7[%c0_13, %c0_14] : memref<1x128xf32, #tpu.memory_space<vmem>>, vector<1x128xf32>
    %16 = vector.broadcast %15 : vector<1x128xf32> to vector<8x128xf32>
    %17 = arith.addf %14, %16 : vector<8x128xf32>
    %c0_15 = arith.constant 0 : index
    %c0_16 = arith.constant 0 : index
    %18 = vector.load %arg8[%c0_15, %c0_16] : memref<8x128xf32, #tpu.memory_space<vmem>>, vector<8x128xf32>
    tpu.vector_store %arg8[%c0_15, %c0_16], %17 {strides = array<i32>} : memref<8x128xf32, #tpu.memory_space<vmem>>, vector<8x128xf32>,
    return
  }
  func.func @transform_0(%arg0: i32) -> (i32, i32) {
    %c0_i32 = arith.constant 0 : i32
    %c0_i32_0 = arith.constant 0 : i32
    return %arg0, %c0_i32 : i32, i32
  }
  func.func @transform_1(%arg0: i32) -> (i32, i32) {
    %c0_i32 = arith.constant 0 : i32
    %c0_i32_0 = arith.constant 0 : i32
    %c0_i32_1 = arith.constant 0 : i32
    return %c0_i32, %c0_i32_0 : i32, i32
  }
  func.func @transform_2(%arg0: i32) -> (i32, i32) {
    %c0_i32 = arith.constant 0 : i32
    %c0_i32_0 = arith.constant 0 : i32
    %c0_i32_1 = arith.constant 0 : i32
    return %c0_i32, %c0_i32_0 : i32, i32
  }
  func.func @transform_3(%arg0: i32) -> (i32, i32) {
    %c0_i32 = arith.constant 0 : i32
    %c0_i32_0 = arith.constant 0 : i32
    %c0_i32_1 = arith.constant 0 : i32
    return %c0_i32, %c0_i32_0 : i32, i32
  }
  func.func @transform_4(%arg0: i32) -> (i32, i32) {
    %c0_i32 = arith.constant 0 : i32
    %c0_i32_0 = arith.constant 0 : i32
    %c0_i32_1 = arith.constant 0 : i32
    return %c0_i32, %c0_i32_0 : i32, i32
  }
  func.func @transform_5(%arg0: i32) -> (i32, i32) {
    %c0_i32 = arith.constant 0 : i32
    %c0_i32_0 = arith.constant 0 : i32
    %c0_i32_1 = arith.constant 0 : i32
    return %c0_i32, %c0_i32_0 : i32, i32
  }
  func.func @transform_6(%arg0: i32) -> (i32, i32) {
    %c0_i32 = arith.constant 0 : i32
    %c0_i32_0 = arith.constant 0 : i32
    %c0_i32_1 = arith.constant 0 : i32
    return %c0_i32, %c0_i32_0 : i32, i32
  }
  func.func @transform_7(%arg0: i32) -> (i32, i32) {
    %c0_i32 = arith.constant 0 : i32
    %c0_i32_0 = arith.constant 0 : i32
    return %arg0, %c0_i32 : i32, i32
  }
}

</mosaic_0001>

<bundles_post_ra>
// kernel: forward.5
= control target key start
LH: loop header
LB: loop body
LE: loop exit
PB: predicated region body
PF: predicated region fallthrough
CT: control target
= control target key end

     0   :  { %vm305_vm0 = vcmask 1043456   ;;  %vm306_vm1 = vcmask 1044480   ;;  %vm220_vm2 = vcmask 203776   ;;  %v1197_v1 = vmov 65535   ;;  %s1551_s1 = inlined_call_operand.vmem [shape: bf16[25,32], index: 1, kind: input, shape index: {}]   ;;  %s1552_s0 = inlined_call_operand.vmem [shape: bf16[440,25], index: 0, kind: input, shape index: {}]   ;;  %s1553_s2 = inlined_call_operand.vmem [shape: bf16[440,32], index: 2, kind: output, shape index: {}]  }
   0x1   :  { %v1167_v0 = vld [vmem:[%s1551_s1] sm:$0xff]   ;;  %v307_v2 = vsel %vm305_vm0, 4294967295, %v1197_v1  ;;  %v1168_v3 = vld [vmem:[%s1551_s1 + $0x8] sm:$0x1f]   ;;  %v1170_v7 = vld [vmem:[%s1552_s0 + $0x70] sm:$0xff]   ;;  %vm844_vm3 = vcmask 257024  }
   0x2   :  { %1102 = vmatprep.subr.bf16.mxu0 %v1167_v0  ;;  %1162 = vmatprep.subr.bf16.mxu1 %v1167_v0  ;;  %v308_v4 = vsel %vm306_vm1, %v307_v2, 0  ;;  %v1169_v5 = vld [vmem:[%s1552_s0] sm:$0xff]   ;;  %v1171_v8 = vld [vmem:[%s1552_s0 + $0x8] sm:$0xff]   ;;  %v1172_v9 = vld [vmem:[%s1552_s0 + $0x78] sm:$0xff]  }
   0x3   :  { %1103 = vmatpush3.bf16.msra.mxu0 %v1167_v0  ;;  %1164 = vmatpush3.bf16.msra.mxu1 %v1167_v0  ;;  %v310_v6 = vand.u32 %v1168_v3, %v308_v4  ;;  %v1173_v10 = vld [vmem:[%s1552_s0 + $0x10] sm:$0xff]   ;;  %v1174_v11 = vld [vmem:[%s1552_s0 + $0x80] sm:$0xff]   ;;  %v1175_v12 = vld [vmem:[%s1552_s0 + $0x18] sm:$0xff]  }
   0x4   :  { %1106 = vmatprep.mubr.msk.bf16.mxu0 %vm220_vm2, %v1169_v5  ;;  %1134 = vmatprep.mubr.msk.bf16.mxu1 %vm220_vm2, %v1170_v7  ;;  %v1176_v13 = vld [vmem:[%s1552_s0 + $0x88] sm:$0xff]   ;;  %v1177_v14 = vld [vmem:[%s1552_s0 + $0x20] sm:$0xff]   ;;  %v1178_v15 = vld [vmem:[%s1552_s0 + $0x90] sm:$0xff]  }
   0x5   :  { %1104 = vmatprep.subr.bf16.mxu0 %v310_v6  ;;  %1163 = vmatprep.subr.bf16.mxu1 %v310_v6  ;;  %v1179_v16 = vld [vmem:[%s1552_s0 + $0x28] sm:$0xff]   ;;  %v1180_v17 = vld [vmem:[%s1552_s0 + $0x98] sm:$0xff]   ;;  %v1181_v18 = vld [vmem:[%s1552_s0 + $0x30] sm:$0xff]  }
   0x6   :  { %v1182_v19 = vld [vmem:[%s1552_s0 + $0xa0] sm:$0xff]   ;;  %v1183_v20 = vld [vmem:[%s1552_s0 + $0x38] sm:$0xff]   ;;  %v1184_v21 = vld [vmem:[%s1552_s0 + $0xa8] sm:$0xff]  }
   0x7   :  { %1105 = vmatpush3.bf16.msra.mxu0 %v310_v6  ;;  %1165 = vmatpush3.bf16.msra.mxu1 %v310_v6  ;;  %v1185_v22 = vld [vmem:[%s1552_s0 + $0x40] sm:$0xff]   ;;  %v1186_v23 = vld [vmem:[%s1552_s0 + $0xb0] sm:$0xff]   ;;  %v1187_v24 = vld [vmem:[%s1552_s0 + $0x48] sm:$0xff]  }
   0x8   :  { %v1188_v25 = vld [vmem:[%s1552_s0 + $0xb8] sm:$0xff]   ;;  %v1189_v26 = vld [vmem:[%s1552_s0 + $0x50] sm:$0xff]   ;;  %v1190_v27 = vld [vmem:[%s1552_s0 + $0xc0] sm:$0xff]  }
   0x9   :  { %v1191_v28 = vld [vmem:[%s1552_s0 + $0x58] sm:$0xff]   ;;  %v1192_v29 = vld [vmem:[%s1552_s0 + $0xc8] sm:$0xff]   ;;  %v1193_v30 = vld [vmem:[%s1552_s0 + $0x60] sm:$0xff]  }
   0xa   :  { %1107 = vmatmul.mubr.msk.bf16.vlgmr.msra.gmra.mrb[0].mxu0 %vm220_vm2, %v1171_v8  ;;  %1135 = vmatmul.mubr.msk.bf16.vlgmr.msra.gmra.mrb[0].mxu1 %vm220_vm2, %v1172_v9  ;;  %v1194_v31 = vld [vmem:[%s1552_s0 + $0xd0] sm:$0xff]   ;;  %v1195_v32 = vld [vmem:[%s1552_s0 + $0x68] sm:$0xff]   ;;  %v1196_v33 = vld [vmem:[%s1552_s0 + $0xd8] ss:$0 sps:$4 sm:$0xff]  }
   0xb   :  { %1110 = vmatprep.mubr.msk.bf16.mxu0 %vm220_vm2, %v1173_v10  ;;  %1138 = vmatprep.mubr.msk.bf16.mxu1 %vm220_vm2, %v1174_v11 }
  0x12   :  { %1111 = vmatmul.mubr.msk.bf16.gmra.mrb[4].mxu0 %vm220_vm2, %v1175_v12  ;;  %1139 = vmatmul.mubr.msk.bf16.gmra.mrb[4].mxu1 %vm220_vm2, %v1176_v13 }
  0x13   :  { %1114 = vmatprep.mubr.msk.bf16.mxu0 %vm220_vm2, %v1177_v14  ;;  %1142 = vmatprep.mubr.msk.bf16.mxu1 %vm220_vm2, %v1178_v15 }
  0x1a   :  { %1115 = vmatmul.mubr.msk.bf16.gmra.mrb[8].mxu0 %vm220_vm2, %v1179_v16  ;;  %1143 = vmatmul.mubr.msk.bf16.gmra.mrb[8].mxu1 %vm220_vm2, %v1180_v17 }
  0x1b   :  { %1118 = vmatprep.mubr.msk.bf16.mxu0 %vm220_vm2, %v1181_v18  ;;  %1146 = vmatprep.mubr.msk.bf16.mxu1 %vm220_vm2, %v1182_v19 }
  0x22   :  { %1119 = vmatmul.mubr.msk.bf16.gmra.mrb[12].mxu0 %vm220_vm2, %v1183_v20  ;;  %1147 = vmatmul.mubr.msk.bf16.gmra.mrb[12].mxu1 %vm220_vm2, %v1184_v21 }
  0x23   :  { %1122 = vmatprep.mubr.msk.bf16.mxu0 %vm220_vm2, %v1185_v22  ;;  %1150 = vmatprep.mubr.msk.bf16.mxu1 %vm220_vm2, %v1186_v23 }
  0x2a   :  { %1123 = vmatmul.mubr.msk.bf16.gmra.mrb[16].mxu0 %vm220_vm2, %v1187_v24  ;;  %1151 = vmatmul.mubr.msk.bf16.gmra.mrb[16].mxu1 %vm220_vm2, %v1188_v25 }
  0x2b   :  { %1126 = vmatprep.mubr.msk.bf16.mxu0 %vm220_vm2, %v1189_v26  ;;  %1154 = vmatprep.mubr.msk.bf16.mxu1 %vm220_vm2, %v1190_v27 }
  0x32   :  { %1127 = vmatmul.mubr.msk.bf16.gmra.mrb[20].mxu0 %vm220_vm2, %v1191_v28  ;;  %1155 = vmatmul.mubr.msk.bf16.gmra.mrb[20].mxu1 %vm220_vm2, %v1192_v29 }
  0x33   :  { %1130 = vmatprep.mubr.msk.bf16.mxu0 %vm220_vm2, %v1193_v30  ;;  %1158 = vmatprep.mubr.msk.bf16.mxu1 %vm220_vm2, %v1194_v31 }
  0x3a   :  { %1131 = vmatmul.mubr.msk.bf16.gmra.mrb[24].mxu0 %vm220_vm2, %v1195_v32  ;;  %1159 = vmatmul.mubr.msk.bf16.gmra.mrb[24].mxu1 %vm220_vm2, %v1196_v33 }
  0xdd   :  { %v1108_v34 = vpop.f32.mrb[0].mxu0  ;;  %v1136_v35 = vpop.f32.mrb[0].mxu1 }
  0xde   :  { %v570_v36 = vmax.f32 %v1108_v34, 0.0  ;;  %v598_v37 = vmax.f32 %v1136_v35, 0.0  ;;  %v346_v38 = vpop.f32.mrb[1].mxu0  ;;  %v458_v39 = vpop.f32.mrb[1].mxu1 }
  0xdf   :  { %v568_v40 = vmax.f32 %v346_v38, 0.0  ;;  %v596_v41 = vmax.f32 %v458_v39, 0.0  ;;  %v1109_v42 = vpop.f32.mrb[2].mxu0  ;;  %v1137_v43 = vpop.f32.mrb[2].mxu1 }
  0xe0   :  { %v1019_v44 = vpack.c.bf16 %v570_v36, %v570_v36  ;;  %v1047_v45 = vpack.c.bf16 %v598_v37, %v598_v37  ;;  %v571_v46 = vmax.f32 %v1109_v42, 0.0  ;;  %v599_v47 = vmax.f32 %v1137_v43, 0.0  ;;  %v349_v48 = vpop.f32.mrb[3].mxu0  ;;  %v461_v49 = vpop.f32.mrb[3].mxu1 }
  0xe1   :  { %v1017_v50 = vpack.c.bf16 %v568_v40, %v568_v40  ;;  %v1045_v51 = vpack.c.bf16 %v596_v41, %v596_v41  ;;  %v569_v52 = vmax.f32 %v349_v48, 0.0  ;;  %v597_v53 = vmax.f32 %v461_v49, 0.0 }
  0xe2   :  { %847 = vst.msk [vmem:[%s1553_s2 + $0x8] sm:$0xf] %vm844_vm3, %v1019_v44  ;;  %875 = vst.msk [vmem:[%s1553_s2 + $0x78] sm:$0xf] %vm844_vm3, %v1047_v45  ;;  %v1020_v54 = vpack.c.bf16 %v571_v46, %v571_v46  ;;  %v1048_v55 = vpack.c.bf16 %v599_v47, %v599_v47 }
  0xe3   :  { %845 = vst.msk [vmem:[%s1553_s2] sm:$0xf] %vm844_vm3, %v1017_v50  ;;  %873 = vst.msk [vmem:[%s1553_s2 + $0x70] sm:$0xf] %vm844_vm3, %v1045_v51  ;;  %v1018_v56 = vpack.c.bf16 %v569_v52, %v569_v52  ;;  %v1046_v57 = vpack.c.bf16 %v597_v53, %v597_v53 }
  0xe4   :  { %848 = vst.msk [vmem:[%s1553_s2 + $0xc] sm:$0xf] %vm844_vm3, %v1020_v54  ;;  %876 = vst.msk [vmem:[%s1553_s2 + $0x7c] sm:$0xf] %vm844_vm3, %v1048_v55 }
  0xe5   :  { %846 = vst.msk [vmem:[%s1553_s2 + $0x4] sm:$0xf] %vm844_vm3, %v1018_v56  ;;  %874 = vst.msk [vmem:[%s1553_s2 + $0x74] sm:$0xf] %vm844_vm3, %v1046_v57  ;;  %v1112_v58 = vpop.f32.mrb[4].mxu0  ;;  %v1140_v59 = vpop.f32.mrb[4].mxu1 }
  0xe6   :  { %v574_v60 = vmax.f32 %v1112_v58, 0.0  ;;  %v602_v61 = vmax.f32 %v1140_v59, 0.0  ;;  %v362_v62 = vpop.f32.mrb[5].mxu0  ;;  %v474_v63 = vpop.f32.mrb[5].mxu1 }
  0xe7   :  { %v572_v0 = vmax.f32 %v362_v62, 0.0  ;;  %v600_v1 = vmax.f32 %v474_v63, 0.0  ;;  %v1113_v2 = vpop.f32.mrb[6].mxu0  ;;  %v1141_v3 = vpop.f32.mrb[6].mxu1 }
  0xe8   :  { %v1023_v4 = vpack.c.bf16 %v574_v60, %v574_v60  ;;  %v1051_v5 = vpack.c.bf16 %v602_v61, %v602_v61  ;;  %v575_v6 = vmax.f32 %v1113_v2, 0.0  ;;  %v603_v7 = vmax.f32 %v1141_v3, 0.0  ;;  %v365_v8 = vpop.f32.mrb[7].mxu0  ;;  %v477_v9 = vpop.f32.mrb[7].mxu1 }
  0xe9   :  { %v1021_v10 = vpack.c.bf16 %v572_v0, %v572_v0  ;;  %v1049_v11 = vpack.c.bf16 %v600_v1, %v600_v1  ;;  %v573_v12 = vmax.f32 %v365_v8, 0.0  ;;  %v601_v13 = vmax.f32 %v477_v9, 0.0 }
  0xea   :  { %851 = vst.msk [vmem:[%s1553_s2 + $0x18] sm:$0xf] %vm844_vm3, %v1023_v4  ;;  %879 = vst.msk [vmem:[%s1553_s2 + $0x88] sm:$0xf] %vm844_vm3, %v1051_v5  ;;  %v1024_v14 = vpack.c.bf16 %v575_v6, %v575_v6  ;;  %v1052_v15 = vpack.c.bf16 %v603_v7, %v603_v7 }
  0xeb   :  { %849 = vst.msk [vmem:[%s1553_s2 + $0x10] sm:$0xf] %vm844_vm3, %v1021_v10  ;;  %877 = vst.msk [vmem:[%s1553_s2 + $0x80] sm:$0xf] %vm844_vm3, %v1049_v11  ;;  %v1022_v16 = vpack.c.bf16 %v573_v12, %v573_v12  ;;  %v1050_v17 = vpack.c.bf16 %v601_v13, %v601_v13 }
  0xec   :  { %852 = vst.msk [vmem:[%s1553_s2 + $0x1c] sm:$0xf] %vm844_vm3, %v1024_v14  ;;  %880 = vst.msk [vmem:[%s1553_s2 + $0x8c] sm:$0xf] %vm844_vm3, %v1052_v15 }
  0xed   :  { %850 = vst.msk [vmem:[%s1553_s2 + $0x14] sm:$0xf] %vm844_vm3, %v1022_v16  ;;  %878 = vst.msk [vmem:[%s1553_s2 + $0x84] sm:$0xf] %vm844_vm3, %v1050_v17  ;;  %v1116_v18 = vpop.f32.mrb[8].mxu0  ;;  %v1144_v19 = vpop.f32.mrb[8].mxu1 }
  0xee   :  { %v578_v20 = vmax.f32 %v1116_v18, 0.0  ;;  %v606_v21 = vmax.f32 %v1144_v19, 0.0  ;;  %v378_v22 = vpop.f32.mrb[9].mxu0  ;;  %v490_v23 = vpop.f32.mrb[9].mxu1 }
  0xef   :  { %v576_v24 = vmax.f32 %v378_v22, 0.0  ;;  %v604_v25 = vmax.f32 %v490_v23, 0.0  ;;  %v1117_v26 = vpop.f32.mrb[10].mxu0  ;;  %v1145_v27 = vpop.f32.mrb[10].mxu1 }
  0xf0   :  { %v1027_v28 = vpack.c.bf16 %v578_v20, %v578_v20  ;;  %v1055_v29 = vpack.c.bf16 %v606_v21, %v606_v21  ;;  %v579_v30 = vmax.f32 %v1117_v26, 0.0  ;;  %v607_v31 = vmax.f32 %v1145_v27, 0.0  ;;  %v381_v32 = vpop.f32.mrb[11].mxu0  ;;  %v493_v33 = vpop.f32.mrb[11].mxu1 }
  0xf1   :  { %v1025_v34 = vpack.c.bf16 %v576_v24, %v576_v24  ;;  %v1053_v35 = vpack.c.bf16 %v604_v25, %v604_v25  ;;  %v577_v36 = vmax.f32 %v381_v32, 0.0  ;;  %v605_v37 = vmax.f32 %v493_v33, 0.0 }
  0xf2   :  { %855 = vst.msk [vmem:[%s1553_s2 + $0x28] sm:$0xf] %vm844_vm3, %v1027_v28  ;;  %883 = vst.msk [vmem:[%s1553_s2 + $0x98] sm:$0xf] %vm844_vm3, %v1055_v29  ;;  %v1028_v38 = vpack.c.bf16 %v579_v30, %v579_v30  ;;  %v1056_v39 = vpack.c.bf16 %v607_v31, %v607_v31 }
  0xf3   :  { %853 = vst.msk [vmem:[%s1553_s2 + $0x20] sm:$0xf] %vm844_vm3, %v1025_v34  ;;  %881 = vst.msk [vmem:[%s1553_s2 + $0x90] sm:$0xf] %vm844_vm3, %v1053_v35  ;;  %v1026_v40 = vpack.c.bf16 %v577_v36, %v577_v36  ;;  %v1054_v41 = vpack.c.bf16 %v605_v37, %v605_v37 }
  0xf4   :  { %856 = vst.msk [vmem:[%s1553_s2 + $0x2c] sm:$0xf] %vm844_vm3, %v1028_v38  ;;  %884 = vst.msk [vmem:[%s1553_s2 + $0x9c] sm:$0xf] %vm844_vm3, %v1056_v39 }
  0xf5   :  { %854 = vst.msk [vmem:[%s1553_s2 + $0x24] sm:$0xf] %vm844_vm3, %v1026_v40  ;;  %882 = vst.msk [vmem:[%s1553_s2 + $0x94] sm:$0xf] %vm844_vm3, %v1054_v41  ;;  %v1120_v42 = vpop.f32.mrb[12].mxu0  ;;  %v1148_v43 = vpop.f32.mrb[12].mxu1 }
  0xf6   :  { %v582_v44 = vmax.f32 %v1120_v42, 0.0  ;;  %v610_v45 = vmax.f32 %v1148_v43, 0.0  ;;  %v394_v46 = vpop.f32.mrb[13].mxu0  ;;  %v506_v47 = vpop.f32.mrb[13].mxu1 }
  0xf7   :  { %v580_v48 = vmax.f32 %v394_v46, 0.0  ;;  %v608_v49 = vmax.f32 %v506_v47, 0.0  ;;  %v1121_v50 = vpop.f32.mrb[14].mxu0  ;;  %v1149_v51 = vpop.f32.mrb[14].mxu1 }
  0xf8   :  { %v1031_v52 = vpack.c.bf16 %v582_v44, %v582_v44  ;;  %v1059_v53 = vpack.c.bf16 %v610_v45, %v610_v45  ;;  %v583_v54 = vmax.f32 %v1121_v50, 0.0  ;;  %v611_v55 = vmax.f32 %v1149_v51, 0.0  ;;  %v397_v56 = vpop.f32.mrb[15].mxu0  ;;  %v509_v57 = vpop.f32.mrb[15].mxu1 }
  0xf9   :  { %v1029_v58 = vpack.c.bf16 %v580_v48, %v580_v48  ;;  %v1057_v59 = vpack.c.bf16 %v608_v49, %v608_v49  ;;  %v581_v60 = vmax.f32 %v397_v56, 0.0  ;;  %v609_v61 = vmax.f32 %v509_v57, 0.0 }
  0xfa   :  { %859 = vst.msk [vmem:[%s1553_s2 + $0x38] sm:$0xf] %vm844_vm3, %v1031_v52  ;;  %887 = vst.msk [vmem:[%s1553_s2 + $0xa8] sm:$0xf] %vm844_vm3, %v1059_v53  ;;  %v1032_v62 = vpack.c.bf16 %v583_v54, %v583_v54  ;;  %v1060_v63 = vpack.c.bf16 %v611_v55, %v611_v55 }
  0xfb   :  { %857 = vst.msk [vmem:[%s1553_s2 + $0x30] sm:$0xf] %vm844_vm3, %v1029_v58  ;;  %885 = vst.msk [vmem:[%s1553_s2 + $0xa0] sm:$0xf] %vm844_vm3, %v1057_v59  ;;  %v1030_v0 = vpack.c.bf16 %v581_v60, %v581_v60  ;;  %v1058_v1 = vpack.c.bf16 %v609_v61, %v609_v61 }
  0xfc   :  { %860 = vst.msk [vmem:[%s1553_s2 + $0x3c] sm:$0xf] %vm844_vm3, %v1032_v62  ;;  %888 = vst.msk [vmem:[%s1553_s2 + $0xac] sm:$0xf] %vm844_vm3, %v1060_v63 }
  0xfd   :  { %858 = vst.msk [vmem:[%s1553_s2 + $0x34] sm:$0xf] %vm844_vm3, %v1030_v0  ;;  %886 = vst.msk [vmem:[%s1553_s2 + $0xa4] sm:$0xf] %vm844_vm3, %v1058_v1  ;;  %v1124_v2 = vpop.f32.mrb[16].mxu0  ;;  %v1152_v3 = vpop.f32.mrb[16].mxu1 }
  0xfe   :  { %v586_v4 = vmax.f32 %v1124_v2, 0.0  ;;  %v614_v5 = vmax.f32 %v1152_v3, 0.0  ;;  %v410_v6 = vpop.f32.mrb[17].mxu0  ;;  %v522_v7 = vpop.f32.mrb[17].mxu1 }
  0xff   :  { %v584_v8 = vmax.f32 %v410_v6, 0.0  ;;  %v612_v9 = vmax.f32 %v522_v7, 0.0  ;;  %v1125_v10 = vpop.f32.mrb[18].mxu0  ;;  %v1153_v11 = vpop.f32.mrb[18].mxu1 }
 0x100   :  { %v1035_v12 = vpack.c.bf16 %v586_v4, %v586_v4  ;;  %v1063_v13 = vpack.c.bf16 %v614_v5, %v614_v5  ;;  %v587_v14 = vmax.f32 %v1125_v10, 0.0  ;;  %v615_v15 = vmax.f32 %v1153_v11, 0.0  ;;  %v413_v16 = vpop.f32.mrb[19].mxu0  ;;  %v525_v17 = vpop.f32.mrb[19].mxu1 }
 0x101   :  { %v1033_v18 = vpack.c.bf16 %v584_v8, %v584_v8  ;;  %v1061_v19 = vpack.c.bf16 %v612_v9, %v612_v9  ;;  %v585_v20 = vmax.f32 %v413_v16, 0.0  ;;  %v613_v21 = vmax.f32 %v525_v17, 0.0 }
 0x102   :  { %863 = vst.msk [vmem:[%s1553_s2 + $0x48] sm:$0xf] %vm844_vm3, %v1035_v12  ;;  %891 = vst.msk [vmem:[%s1553_s2 + $0xb8] sm:$0xf] %vm844_vm3, %v1063_v13  ;;  %v1036_v22 = vpack.c.bf16 %v587_v14, %v587_v14  ;;  %v1064_v23 = vpack.c.bf16 %v615_v15, %v615_v15 }
 0x103   :  { %861 = vst.msk [vmem:[%s1553_s2 + $0x40] sm:$0xf] %vm844_vm3, %v1033_v18  ;;  %889 = vst.msk [vmem:[%s1553_s2 + $0xb0] sm:$0xf] %vm844_vm3, %v1061_v19  ;;  %v1034_v24 = vpack.c.bf16 %v585_v20, %v585_v20  ;;  %v1062_v25 = vpack.c.bf16 %v613_v21, %v613_v21 }
 0x104   :  { %864 = vst.msk [vmem:[%s1553_s2 + $0x4c] sm:$0xf] %vm844_vm3, %v1036_v22  ;;  %892 = vst.msk [vmem:[%s1553_s2 + $0xbc] sm:$0xf] %vm844_vm3, %v1064_v23 }
 0x105   :  { %862 = vst.msk [vmem:[%s1553_s2 + $0x44] sm:$0xf] %vm844_vm3, %v1034_v24  ;;  %890 = vst.msk [vmem:[%s1553_s2 + $0xb4] sm:$0xf] %vm844_vm3, %v1062_v25  ;;  %v1128_v26 = vpop.f32.mrb[20].mxu0  ;;  %v1156_v27 = vpop.f32.mrb[20].mxu1 }
 0x106   :  { %v590_v28 = vmax.f32 %v1128_v26, 0.0  ;;  %v618_v29 = vmax.f32 %v1156_v27, 0.0  ;;  %v426_v30 = vpop.f32.mrb[21].mxu0  ;;  %v538_v31 = vpop.f32.mrb[21].mxu1 }
 0x107   :  { %v588_v32 = vmax.f32 %v426_v30, 0.0  ;;  %v616_v33 = vmax.f32 %v538_v31, 0.0  ;;  %v1129_v34 = vpop.f32.mrb[22].mxu0  ;;  %v1157_v35 = vpop.f32.mrb[22].mxu1 }
 0x108   :  { %v1039_v36 = vpack.c.bf16 %v590_v28, %v590_v28  ;;  %v1067_v37 = vpack.c.bf16 %v618_v29, %v618_v29  ;;  %v591_v38 = vmax.f32 %v1129_v34, 0.0  ;;  %v619_v39 = vmax.f32 %v1157_v35, 0.0  ;;  %v429_v40 = vpop.f32.mrb[23].mxu0  ;;  %v541_v41 = vpop.f32.mrb[23].mxu1 }
 0x109   :  { %v1037_v42 = vpack.c.bf16 %v588_v32, %v588_v32  ;;  %v1065_v43 = vpack.c.bf16 %v616_v33, %v616_v33  ;;  %v589_v44 = vmax.f32 %v429_v40, 0.0  ;;  %v617_v45 = vmax.f32 %v541_v41, 0.0 }
 0x10a   :  { %867 = vst.msk [vmem:[%s1553_s2 + $0x58] sm:$0xf] %vm844_vm3, %v1039_v36  ;;  %895 = vst.msk [vmem:[%s1553_s2 + $0xc8] sm:$0xf] %vm844_vm3, %v1067_v37  ;;  %v1040_v46 = vpack.c.bf16 %v591_v38, %v591_v38  ;;  %v1068_v47 = vpack.c.bf16 %v619_v39, %v619_v39 }
 0x10b   :  { %865 = vst.msk [vmem:[%s1553_s2 + $0x50] sm:$0xf] %vm844_vm3, %v1037_v42  ;;  %893 = vst.msk [vmem:[%s1553_s2 + $0xc0] sm:$0xf] %vm844_vm3, %v1065_v43  ;;  %v1038_v48 = vpack.c.bf16 %v589_v44, %v589_v44  ;;  %v1066_v49 = vpack.c.bf16 %v617_v45, %v617_v45 }
 0x10c   :  { %868 = vst.msk [vmem:[%s1553_s2 + $0x5c] sm:$0xf] %vm844_vm3, %v1040_v46  ;;  %896 = vst.msk [vmem:[%s1553_s2 + $0xcc] sm:$0xf] %vm844_vm3, %v1068_v47 }
 0x10d   :  { %866 = vst.msk [vmem:[%s1553_s2 + $0x54] sm:$0xf] %vm844_vm3, %v1038_v48  ;;  %894 = vst.msk [vmem:[%s1553_s2 + $0xc4] sm:$0xf] %vm844_vm3, %v1066_v49  ;;  %v1132_v50 = vpop.f32.mrb[24].mxu0  ;;  %v1160_v51 = vpop.f32.mrb[24].mxu1 }
 0x10e   :  { %v594_v52 = vmax.f32 %v1132_v50, 0.0  ;;  %v622_v53 = vmax.f32 %v1160_v51, 0.0  ;;  %v442_v54 = vpop.f32.mrb[25].mxu0  ;;  %v554_v55 = vpop.f32.mrb[25].mxu1 }
 0x10f   :  { %v592_v56 = vmax.f32 %v442_v54, 0.0  ;;  %v620_v57 = vmax.f32 %v554_v55, 0.0  ;;  %v1133_v58 = vpop.f32.mrb[26].mxu0  ;;  %v1161_v59 = vpop.f32.mrb[26].mxu1 }
 0x110   :  { %v1043_v60 = vpack.c.bf16 %v594_v52, %v594_v52  ;;  %v1071_v61 = vpack.c.bf16 %v622_v53, %v622_v53  ;;  %v595_v62 = vmax.f32 %v1133_v58, 0.0  ;;  %v445_v63 = vpop.f32.mrb[27].mxu0  ;;  %v557_v0 = vpop.f32.mrb[27].mxu1 }
 0x111   :  { %v1041_v1 = vpack.c.bf16 %v592_v56, %v592_v56  ;;  %v1069_v2 = vpack.c.bf16 %v620_v57, %v620_v57  ;;  %v593_v3 = vmax.f32 %v445_v63, 0.0  ;;  %v621_v4 = vmax.f32 %v557_v0, 0.0 }
 0x112   :  { %871 = vst.msk [vmem:[%s1553_s2 + $0x68] sm:$0xf] %vm844_vm3, %v1043_v60  ;;  %899 = vst.msk [vmem:[%s1553_s2 + $0xd8] sm:$0xf] %vm844_vm3, %v1071_v61  ;;  %v1044_v5 = vpack.c.bf16 %v595_v62, %v595_v62 }
 0x113   :  { %869 = vst.msk [vmem:[%s1553_s2 + $0x60] sm:$0xf] %vm844_vm3, %v1041_v1  ;;  %897 = vst.msk [vmem:[%s1553_s2 + $0xd0] sm:$0xf] %vm844_vm3, %v1069_v2  ;;  %v1042_v6 = vpack.c.bf16 %v593_v3, %v593_v3  ;;  %v1070_v7 = vpack.c.bf16 %v621_v4, %v621_v4 }
 0x114   :  { %872 = vst.msk [vmem:[%s1553_s2 + $0x6c] sm:$0xf] %vm844_vm3, %v1044_v5 }
 0x115   :  { %870 = vst.msk [vmem:[%s1553_s2 + $0x64] sm:$0xf] %vm844_vm3, %v1042_v6  ;;  %898 = vst.msk [vmem:[%s1553_s2 + $0xd4] sm:$0xf] %vm844_vm3, %v1070_v7 }

// kernel: forward.6
= control target key start
LH: loop header
LB: loop body
LE: loop exit
PB: predicated region body
PF: predicated region fallthrough
CT: control target
= control target key end

     0   :  { %vm684_vm0 = vcmask 257024   ;;  %s1232_s1 = inlined_call_operand.vmem [shape: bf16[512,32], index: 1, kind: input, shape index: {}]   ;;  %s1233_s0 = inlined_call_operand.vmem [shape: bf16[112,512], index: 0, kind: input, shape index: {}]   ;;  %s1234_s2 = inlined_call_operand.vmem [shape: bf16[112,32], index: 2, kind: output, shape index: {}]  }
   0x1   :  { %v907_v0 = vld [vmem:[%s1232_s1 + $0x40] sm:$0xff]   ;;  %v911_v4 = vld [vmem:[%s1232_s1 + $0x48] sm:$0xff]   ;;  %v915_v8 = vld [vmem:[%s1232_s1 + $0x50] sm:$0xff]  }
   0x2   :  { %v908_v1 = vld [vmem:[%s1232_s1 + $0xc0] sm:$0xff]   ;;  %791 = vmatprep.subr.bf16.mxu0 %v907_v0  ;;  %v912_v5 = vld [vmem:[%s1232_s1 + $0xc8] sm:$0xff]   ;;  %v916_v9 = vld [vmem:[%s1232_s1 + $0xd0] sm:$0xff]  }
   0x3   :  { %v909_v2 = vld [vmem:[%s1232_s1] sm:$0xff]   ;;  %849 = vmatprep.subr.bf16.mxu1 %v908_v1  ;;  %v913_v6 = vld [vmem:[%s1232_s1 + $0x8] sm:$0xff]   ;;  %v917_v10 = vld [vmem:[%s1232_s1 + $0x10] sm:$0xff]  }
   0x4   :  { %v910_v3 = vld [vmem:[%s1232_s1 + $0x80] sm:$0xff]   ;;  %792 = vmatpush3.bf16.msra.mxu0 %v909_v2  ;;  %v914_v7 = vld [vmem:[%s1232_s1 + $0x88] sm:$0xff]   ;;  %v918_v11 = vld [vmem:[%s1232_s1 + $0x90] sm:$0xff]  }
   0x5   :  { %850 = vmatpush3.bf16.msra.mxu1 %v910_v3  ;;  %793 = vmatprep.subr.bf16.mxu0 %v911_v4  ;;  %v919_v12 = vld [vmem:[%s1232_s1 + $0x58] sm:$0xff]   ;;  %v923_v16 = vld [vmem:[%s1232_s1 + $0x60] sm:$0xff]   ;;  %v927_v20 = vld [vmem:[%s1232_s1 + $0x68] sm:$0xff]  }
   0x6   :  { %851 = vmatprep.subr.bf16.mxu1 %v912_v5  ;;  %v920_v13 = vld [vmem:[%s1232_s1 + $0xd8] sm:$0xff]   ;;  %v924_v17 = vld [vmem:[%s1232_s1 + $0xe0] sm:$0xff]   ;;  %v928_v21 = vld [vmem:[%s1232_s1 + $0xe8] sm:$0xff]  }
   0x7   :  { %v921_v14 = vld [vmem:[%s1232_s1 + $0x18] sm:$0xff]   ;;  %v925_v18 = vld [vmem:[%s1232_s1 + $0x20] sm:$0xff]   ;;  %v929_v22 = vld [vmem:[%s1232_s1 + $0x28] sm:$0xff]  }
   0x8   :  { %794 = vmatpush3.bf16.msra.mxu0 %v913_v6  ;;  %v922_v15 = vld [vmem:[%s1232_s1 + $0x98] sm:$0xff]   ;;  %v926_v19 = vld [vmem:[%s1232_s1 + $0xa0] sm:$0xff]   ;;  %v930_v23 = vld [vmem:[%s1232_s1 + $0xa8] sm:$0xff]  }
   0x9   :  { %852 = vmatpush3.bf16.msra.mxu1 %v914_v7  ;;  %795 = vmatprep.subr.bf16.mxu0 %v915_v8  ;;  %v931_v24 = vld [vmem:[%s1232_s1 + $0x70] sm:$0xff]   ;;  %v935_v28 = vld [vmem:[%s1232_s1 + $0x78] sm:$0xff]  }
   0xa   :  { %853 = vmatprep.subr.bf16.mxu1 %v916_v9  ;;  %v932_v25 = vld [vmem:[%s1232_s1 + $0xf0] sm:$0xff]   ;;  %v936_v29 = vld [vmem:[%s1232_s1 + $0xf8] sm:$0xff]  }
   0xb   :  { %v933_v26 = vld [vmem:[%s1232_s1 + $0x30] sm:$0xff]   ;;  %v937_v30 = vld [vmem:[%s1232_s1 + $0x38] sm:$0xff]  }
   0xc   :  { %796 = vmatpush3.bf16.msra.mxu0 %v917_v10  ;;  %v934_v27 = vld [vmem:[%s1232_s1 + $0xb0] sm:$0xff]   ;;  %v938_v31 = vld [vmem:[%s1232_s1 + $0xb8] sm:$0xff]  }
   0xd   :  { %854 = vmatpush3.bf16.msra.mxu1 %v918_v11  ;;  %797 = vmatprep.subr.bf16.mxu0 %v919_v12  ;;  %v939_v32 = vld [vmem:[%s1233_s0] ss:$16 sps:$4 sm:$0xff]   ;;  %v941_v33 = vld [vmem:[%s1233_s0 + $0x4] ss:$16 sps:$4 sm:$0xff]   ;;  %v942_v34 = vld [vmem:[%s1233_s0 + $0x8] ss:$16 sps:$4 sm:$0xff]  }
   0xe   :  { %855 = vmatprep.subr.bf16.mxu1 %v920_v13  ;;  %v944_v35 = vld [vmem:[%s1233_s0 + $0xc] ss:$16 sps:$4 sm:$0xff]   ;;  %468 = vmatprep.mubr.bf16.mxu0 %v941_v33  ;;  %v945_v36 = vld [vmem:[%s1233_s0 + $0x24] ss:$16 sps:$4 sm:$0xff]   ;;  %v949_v38 = vld [vmem:[%s1233_s0 + $0x20] ss:$16 sps:$4 sm:$0xff]  }
   0xf   :  { %557 = vmatprep.mubr.bf16.mxu1 %v944_v35  ;;  %v947_v37 = vld [vmem:[%s1233_s0 + $0x2c] ss:$16 sps:$4 sm:$0xff]   ;;  %v950_v39 = vld [vmem:[%s1233_s0 + $0x28] ss:$16 sps:$4 sm:$0xff]   ;;  %v951_v40 = vld [vmem:[%s1233_s0 + $0x44] ss:$16 sps:$4 sm:$0xff]  }
  0x10   :  { %798 = vmatpush3.bf16.msra.mxu0 %v921_v14  ;;  %v953_v41 = vld [vmem:[%s1233_s0 + $0x4c] ss:$16 sps:$4 sm:$0xff]   ;;  %v955_v42 = vld [vmem:[%s1233_s0 + $0x40] ss:$16 sps:$4 sm:$0xff]   ;;  %v956_v43 = vld [vmem:[%s1233_s0 + $0x48] ss:$16 sps:$4 sm:$0xff]  }
  0x11   :  { %856 = vmatpush3.bf16.msra.mxu1 %v922_v15  ;;  %799 = vmatprep.subr.bf16.mxu0 %v923_v16  ;;  %v957_v44 = vld [vmem:[%s1233_s0 + $0x64] ss:$16 sps:$4 sm:$0xff]   ;;  %v959_v45 = vld [vmem:[%s1233_s0 + $0x6c] ss:$16 sps:$4 sm:$0xff]   ;;  %v961_v46 = vld [vmem:[%s1233_s0 + $0x60] ss:$16 sps:$4 sm:$0xff]  }
  0x12   :  { %857 = vmatprep.subr.bf16.mxu1 %v924_v17  ;;  %v962_v47 = vld [vmem:[%s1233_s0 + $0x68] ss:$16 sps:$4 sm:$0xff]   ;;  %v963_v48 = vld [vmem:[%s1233_s0 + $0x84] ss:$16 sps:$4 sm:$0xff]   ;;  %v965_v49 = vld [vmem:[%s1233_s0 + $0x8c] ss:$16 sps:$4 sm:$0xff]  }
  0x13   :  { %v967_v50 = vld [vmem:[%s1233_s0 + $0x80] ss:$16 sps:$4 sm:$0xff]   ;;  %v968_v51 = vld [vmem:[%s1233_s0 + $0x88] ss:$16 sps:$4 sm:$0xff]   ;;  %v969_v52 = vld [vmem:[%s1233_s0 + $0xa4] ss:$16 sps:$4 sm:$0xff]  }
  0x14   :  { %800 = vmatpush3.bf16.msra.mxu0 %v925_v18  ;;  %v971_v53 = vld [vmem:[%s1233_s0 + $0xac] ss:$16 sps:$4 sm:$0xff]   ;;  %v973_v54 = vld [vmem:[%s1233_s0 + $0xa0] ss:$16 sps:$4 sm:$0xff]   ;;  %v974_v55 = vld [vmem:[%s1233_s0 + $0xa8] ss:$16 sps:$4 sm:$0xff]  }
  0x15   :  { %858 = vmatpush3.bf16.msra.mxu1 %v926_v19  ;;  %801 = vmatprep.subr.bf16.mxu0 %v927_v20  ;;  %v975_v56 = vld [vmem:[%s1233_s0 + $0xc4] ss:$16 sps:$4 sm:$0xff]   ;;  %v977_v57 = vld [vmem:[%s1233_s0 + $0xcc] ss:$16 sps:$4 sm:$0xff]   ;;  %v979_v58 = vld [vmem:[%s1233_s0 + $0xc0] ss:$16 sps:$4 sm:$0xff]  }
  0x16   :  { %859 = vmatprep.subr.bf16.mxu1 %v928_v21  ;;  %v980_v59 = vld [vmem:[%s1233_s0 + $0xc8] ss:$16 sps:$4 sm:$0xff]  }
  0x18   :  { %802 = vmatpush3.bf16.msra.mxu0 %v929_v22 }
  0x19   :  { %860 = vmatpush3.bf16.msra.mxu1 %v930_v23  ;;  %803 = vmatprep.subr.bf16.mxu0 %v931_v24 }
  0x1a   :  { %861 = vmatprep.subr.bf16.mxu1 %v932_v25 }
  0x1c   :  { %804 = vmatpush3.bf16.msra.mxu0 %v933_v26 }
  0x1d   :  { %862 = vmatpush3.bf16.msra.mxu1 %v934_v27  ;;  %805 = vmatprep.subr.bf16.mxu0 %v935_v28 }
  0x1e   :  { %863 = vmatprep.subr.bf16.mxu1 %v936_v29 }
  0x20   :  { %806 = vmatpush3.bf16.msra.mxu0 %v937_v30 }
  0x21   :  { %864 = vmatpush3.bf16.msra.mxu1 %v938_v31 }
  0x23   :  { %469 = vmatmul.mubr.bf16.vlgmr.msra.gmra.mrb[0].mxu0 %v939_v32 }
  0x24   :  { %558 = vmatmul.mubr.bf16.vlgmr.msra.gmra.mrb[0].mxu1 %v942_v34  ;;  %476 = vmatprep.mubr.bf16.mxu0 %v945_v36 }
  0x25   :  { %565 = vmatprep.mubr.bf16.mxu1 %v947_v37 }
  0x2b   :  { %477 = vmatmul.mubr.bf16.gmra.mrb[4].mxu0 %v949_v38 }
  0x2c   :  { %566 = vmatmul.mubr.bf16.gmra.mrb[4].mxu1 %v950_v39  ;;  %484 = vmatprep.mubr.bf16.mxu0 %v951_v40 }
  0x2d   :  { %573 = vmatprep.mubr.bf16.mxu1 %v953_v41 }
  0x33   :  { %485 = vmatmul.mubr.bf16.gmra.mrb[8].mxu0 %v955_v42 }
  0x34   :  { %574 = vmatmul.mubr.bf16.gmra.mrb[8].mxu1 %v956_v43  ;;  %492 = vmatprep.mubr.bf16.mxu0 %v957_v44 }
  0x35   :  { %581 = vmatprep.mubr.bf16.mxu1 %v959_v45 }
  0x3b   :  { %493 = vmatmul.mubr.bf16.gmra.mrb[12].mxu0 %v961_v46 }
  0x3c   :  { %582 = vmatmul.mubr.bf16.gmra.mrb[12].mxu1 %v962_v47  ;;  %500 = vmatprep.mubr.bf16.mxu0 %v963_v48 }
  0x3d   :  { %589 = vmatprep.mubr.bf16.mxu1 %v965_v49 }
  0x43   :  { %501 = vmatmul.mubr.bf16.gmra.mrb[16].mxu0 %v967_v50 }
  0x44   :  { %590 = vmatmul.mubr.bf16.gmra.mrb[16].mxu1 %v968_v51  ;;  %508 = vmatprep.mubr.bf16.mxu0 %v969_v52 }
  0x45   :  { %597 = vmatprep.mubr.bf16.mxu1 %v971_v53 }
  0x4b   :  { %509 = vmatmul.mubr.bf16.gmra.mrb[20].mxu0 %v973_v54 }
  0x4c   :  { %598 = vmatmul.mubr.bf16.gmra.mrb[20].mxu1 %v974_v55  ;;  %516 = vmatprep.mubr.bf16.mxu0 %v975_v56 }
  0x4d   :  { %605 = vmatprep.mubr.bf16.mxu1 %v977_v57 }
  0x53   :  { %517 = vmatmul.mubr.bf16.gmra.mrb[24].mxu0 %v979_v58 }
  0x54   :  { %606 = vmatmul.mubr.bf16.gmra.mrb[24].mxu1 %v980_v59 }
  0xf6   :  { %v807_v60 = vpop.f32.mrb[0].mxu0 }
  0xf7   :  { %v865_v61 = vpop.f32.mrb[0].mxu1  ;;  %v808_v62 = vpop.f32.mrb[1].mxu0 }
  0xf8   :  { %v809_v63 = vadd.f32 %v808_v62, %v807_v60  ;;  %v866_v0 = vpop.f32.mrb[1].mxu1  ;;  %v810_v1 = vpop.f32.mrb[2].mxu0 }
  0xf9   :  { %v867_v2 = vadd.f32 %v866_v0, %v865_v61  ;;  %v868_v3 = vpop.f32.mrb[2].mxu1  ;;  %v811_v4 = vpop.f32.mrb[3].mxu0 }
  0xfa   :  { %v812_v5 = vadd.f32 %v811_v4, %v810_v1  ;;  %v869_v6 = vpop.f32.mrb[3].mxu1 }
  0xfb   :  { %v560_v7 = vadd.f32 %v867_v2, %v809_v63  ;;  %v870_v8 = vadd.f32 %v869_v6, %v868_v3 }
  0xfd   :  { %v614_v9 = vmax.f32 %v560_v7, 0.0  ;;  %v563_v10 = vadd.f32 %v870_v8, %v812_v5 }
  0xfe   :  { %v813_v11 = vpop.f32.mrb[4].mxu0 }
  0xff   :  { %v777_v12 = vpack.c.bf16 %v614_v9, %v614_v9  ;;  %v615_v13 = vmax.f32 %v563_v10, 0.0  ;;  %v871_v14 = vpop.f32.mrb[4].mxu1  ;;  %v814_v15 = vpop.f32.mrb[5].mxu0 }
 0x100   :  { %v815_v16 = vadd.f32 %v814_v15, %v813_v11  ;;  %v872_v17 = vpop.f32.mrb[5].mxu1  ;;  %v816_v18 = vpop.f32.mrb[6].mxu0 }
 0x101   :  { %685 = vst.msk [vmem:[%s1234_s2] sm:$0xf] %vm684_vm0, %v777_v12  ;;  %v778_v19 = vpack.c.bf16 %v615_v13, %v615_v13  ;;  %v873_v20 = vadd.f32 %v872_v17, %v871_v14  ;;  %v874_v21 = vpop.f32.mrb[6].mxu1  ;;  %v817_v22 = vpop.f32.mrb[7].mxu0 }
 0x102   :  { %v818_v23 = vadd.f32 %v817_v22, %v816_v18  ;;  %v875_v24 = vpop.f32.mrb[7].mxu1 }
 0x103   :  { %686 = vst.msk [vmem:[%s1234_s2 + $0x4] sm:$0xf] %vm684_vm0, %v778_v19  ;;  %v568_v25 = vadd.f32 %v873_v20, %v815_v16  ;;  %v876_v26 = vadd.f32 %v875_v24, %v874_v21 }
 0x105   :  { %v616_v27 = vmax.f32 %v568_v25, 0.0  ;;  %v571_v28 = vadd.f32 %v876_v26, %v818_v23 }
 0x106   :  { %v819_v29 = vpop.f32.mrb[8].mxu0 }
 0x107   :  { %v779_v30 = vpack.c.bf16 %v616_v27, %v616_v27  ;;  %v617_v31 = vmax.f32 %v571_v28, 0.0  ;;  %v877_v32 = vpop.f32.mrb[8].mxu1  ;;  %v820_v33 = vpop.f32.mrb[9].mxu0 }
 0x108   :  { %v821_v34 = vadd.f32 %v820_v33, %v819_v29  ;;  %v878_v35 = vpop.f32.mrb[9].mxu1  ;;  %v822_v36 = vpop.f32.mrb[10].mxu0 }
 0x109   :  { %687 = vst.msk [vmem:[%s1234_s2 + $0x8] sm:$0xf] %vm684_vm0, %v779_v30  ;;  %v780_v37 = vpack.c.bf16 %v617_v31, %v617_v31  ;;  %v879_v38 = vadd.f32 %v878_v35, %v877_v32  ;;  %v880_v39 = vpop.f32.mrb[10].mxu1  ;;  %v823_v40 = vpop.f32.mrb[11].mxu0 }
 0x10a   :  { %v824_v41 = vadd.f32 %v823_v40, %v822_v36  ;;  %v881_v42 = vpop.f32.mrb[11].mxu1 }
 0x10b   :  { %688 = vst.msk [vmem:[%s1234_s2 + $0xc] sm:$0xf] %vm684_vm0, %v780_v37  ;;  %v576_v43 = vadd.f32 %v879_v38, %v821_v34  ;;  %v882_v44 = vadd.f32 %v881_v42, %v880_v39 }
 0x10d   :  { %v618_v45 = vmax.f32 %v576_v43, 0.0  ;;  %v579_v46 = vadd.f32 %v882_v44, %v824_v41 }
 0x10e   :  { %v825_v47 = vpop.f32.mrb[12].mxu0 }
 0x10f   :  { %v781_v48 = vpack.c.bf16 %v618_v45, %v618_v45  ;;  %v619_v49 = vmax.f32 %v579_v46, 0.0  ;;  %v883_v50 = vpop.f32.mrb[12].mxu1  ;;  %v826_v51 = vpop.f32.mrb[13].mxu0 }
 0x110   :  { %v827_v52 = vadd.f32 %v826_v51, %v825_v47  ;;  %v884_v53 = vpop.f32.mrb[13].mxu1  ;;  %v828_v54 = vpop.f32.mrb[14].mxu0 }
 0x111   :  { %689 = vst.msk [vmem:[%s1234_s2 + $0x10] sm:$0xf] %vm684_vm0, %v781_v48  ;;  %v782_v55 = vpack.c.bf16 %v619_v49, %v619_v49  ;;  %v885_v56 = vadd.f32 %v884_v53, %v883_v50  ;;  %v886_v57 = vpop.f32.mrb[14].mxu1  ;;  %v829_v58 = vpop.f32.mrb[15].mxu0 }
 0x112   :  { %v830_v59 = vadd.f32 %v829_v58, %v828_v54  ;;  %v887_v60 = vpop.f32.mrb[15].mxu1 }
 0x113   :  { %690 = vst.msk [vmem:[%s1234_s2 + $0x14] sm:$0xf] %vm684_vm0, %v782_v55  ;;  %v584_v61 = vadd.f32 %v885_v56, %v827_v52  ;;  %v888_v62 = vadd.f32 %v887_v60, %v886_v57 }
 0x115   :  { %v620_v63 = vmax.f32 %v584_v61, 0.0  ;;  %v587_v0 = vadd.f32 %v888_v62, %v830_v59 }
 0x116   :  { %v831_v1 = vpop.f32.mrb[16].mxu0 }
 0x117   :  { %v783_v2 = vpack.c.bf16 %v620_v63, %v620_v63  ;;  %v621_v3 = vmax.f32 %v587_v0, 0.0  ;;  %v889_v4 = vpop.f32.mrb[16].mxu1  ;;  %v832_v5 = vpop.f32.mrb[17].mxu0 }
 0x118   :  { %v833_v6 = vadd.f32 %v832_v5, %v831_v1  ;;  %v890_v7 = vpop.f32.mrb[17].mxu1  ;;  %v834_v8 = vpop.f32.mrb[18].mxu0 }
 0x119   :  { %691 = vst.msk [vmem:[%s1234_s2 + $0x18] sm:$0xf] %vm684_vm0, %v783_v2  ;;  %v784_v9 = vpack.c.bf16 %v621_v3, %v621_v3  ;;  %v891_v10 = vadd.f32 %v890_v7, %v889_v4  ;;  %v892_v11 = vpop.f32.mrb[18].mxu1  ;;  %v835_v12 = vpop.f32.mrb[19].mxu0 }
 0x11a   :  { %v836_v13 = vadd.f32 %v835_v12, %v834_v8  ;;  %v893_v14 = vpop.f32.mrb[19].mxu1 }
 0x11b   :  { %692 = vst.msk [vmem:[%s1234_s2 + $0x1c] sm:$0xf] %vm684_vm0, %v784_v9  ;;  %v592_v15 = vadd.f32 %v891_v10, %v833_v6  ;;  %v894_v16 = vadd.f32 %v893_v14, %v892_v11 }
 0x11d   :  { %v622_v17 = vmax.f32 %v592_v15, 0.0  ;;  %v595_v18 = vadd.f32 %v894_v16, %v836_v13 }
 0x11e   :  { %v837_v19 = vpop.f32.mrb[20].mxu0 }
 0x11f   :  { %v785_v20 = vpack.c.bf16 %v622_v17, %v622_v17  ;;  %v623_v21 = vmax.f32 %v595_v18, 0.0  ;;  %v895_v22 = vpop.f32.mrb[20].mxu1  ;;  %v838_v23 = vpop.f32.mrb[21].mxu0 }
 0x120   :  { %v839_v24 = vadd.f32 %v838_v23, %v837_v19  ;;  %v896_v25 = vpop.f32.mrb[21].mxu1  ;;  %v840_v26 = vpop.f32.mrb[22].mxu0 }
 0x121   :  { %693 = vst.msk [vmem:[%s1234_s2 + $0x20] sm:$0xf] %vm684_vm0, %v785_v20  ;;  %v786_v27 = vpack.c.bf16 %v623_v21, %v623_v21  ;;  %v897_v28 = vadd.f32 %v896_v25, %v895_v22  ;;  %v898_v29 = vpop.f32.mrb[22].mxu1  ;;  %v841_v30 = vpop.f32.mrb[23].mxu0 }
 0x122   :  { %v842_v31 = vadd.f32 %v841_v30, %v840_v26  ;;  %v899_v32 = vpop.f32.mrb[23].mxu1 }
 0x123   :  { %694 = vst.msk [vmem:[%s1234_s2 + $0x24] sm:$0xf] %vm684_vm0, %v786_v27  ;;  %v600_v33 = vadd.f32 %v897_v28, %v839_v24  ;;  %v900_v34 = vadd.f32 %v899_v32, %v898_v29 }
 0x125   :  { %v624_v35 = vmax.f32 %v600_v33, 0.0  ;;  %v603_v36 = vadd.f32 %v900_v34, %v842_v31 }
 0x126   :  { %v843_v37 = vpop.f32.mrb[24].mxu0 }
 0x127   :  { %v787_v38 = vpack.c.bf16 %v624_v35, %v624_v35  ;;  %v625_v39 = vmax.f32 %v603_v36, 0.0  ;;  %v901_v40 = vpop.f32.mrb[24].mxu1  ;;  %v844_v41 = vpop.f32.mrb[25].mxu0 }
 0x128   :  { %v845_v42 = vadd.f32 %v844_v41, %v843_v37  ;;  %v902_v43 = vpop.f32.mrb[25].mxu1  ;;  %v846_v44 = vpop.f32.mrb[26].mxu0 }
 0x129   :  { %695 = vst.msk [vmem:[%s1234_s2 + $0x28] sm:$0xf] %vm684_vm0, %v787_v38  ;;  %v788_v45 = vpack.c.bf16 %v625_v39, %v625_v39  ;;  %v903_v46 = vadd.f32 %v902_v43, %v901_v40  ;;  %v904_v47 = vpop.f32.mrb[26].mxu1  ;;  %v847_v48 = vpop.f32.mrb[27].mxu0 }
 0x12a   :  { %v848_v49 = vadd.f32 %v847_v48, %v846_v44  ;;  %v905_v50 = vpop.f32.mrb[27].mxu1 }
 0x12b   :  { %696 = vst.msk [vmem:[%s1234_s2 + $0x2c] sm:$0xf] %vm684_vm0, %v788_v45  ;;  %v608_v51 = vadd.f32 %v903_v46, %v845_v42  ;;  %v906_v52 = vadd.f32 %v905_v50, %v904_v47 }
 0x12d   :  { %v626_v53 = vmax.f32 %v608_v51, 0.0  ;;  %v611_v54 = vadd.f32 %v906_v52, %v848_v49 }
 0x12f   :  { %v789_v55 = vpack.c.bf16 %v626_v53, %v626_v53  ;;  %v627_v56 = vmax.f32 %v611_v54, 0.0 }
 0x131   :  { %697 = vst.msk [vmem:[%s1234_s2 + $0x30] sm:$0xf] %vm684_vm0, %v789_v55  ;;  %v790_v57 = vpack.c.bf16 %v627_v56, %v627_v56 }
 0x133   :  { %698 = vst.msk [vmem:[%s1234_s2 + $0x34] sm:$0xf] %vm684_vm0, %v790_v57 }

// kernel: forward.7
= control target key start
LH: loop header
LB: loop body
LE: loop exit
PB: predicated region body
PF: predicated region fallthrough
CT: control target
= control target key end

     0   :  { %v1651_v36 = vmov 0.0   ;;  %vm1652_vm0 = vmmov 0   ;;  %vm713_vm1 = vcmask 261120   ;;  %vm1161_vm2 = vcmask 257024   ;;  %s2086_s1 = inlined_call_operand.vmem [shape: bf16[800,32], index: 1, kind: input, shape index: {}]   ;;  %s2087_s0 = inlined_call_operand.vmem [shape: bf16[112,800], index: 0, kind: input, shape index: {}]   ;;  %s2088_s2 = inlined_call_operand.vmem [shape: bf16[112,32], index: 2, kind: output, shape index: {}]  }
   0x1   :  { %v1531_v0 = vld [vmem:[%s2086_s1 + $0x40] sm:$0xff]   ;;  %v1535_v4 = vld [vmem:[%s2086_s1 + $0x48] sm:$0xff]   ;;  %v1539_v8 = vld [vmem:[%s2086_s1 + $0x50] sm:$0xff]  }
   0x2   :  { %v1532_v1 = vld [vmem:[%s2086_s1 + $0xc0] sm:$0xff]   ;;  %1314 = vmatprep.subr.bf16.mxu0 %v1531_v0  ;;  %v1536_v5 = vld [vmem:[%s2086_s1 + $0xc8] sm:$0xff]   ;;  %v1540_v9 = vld [vmem:[%s2086_s1 + $0xd0] sm:$0xff]  }
   0x3   :  { %v1533_v2 = vld [vmem:[%s2086_s1] sm:$0xff]   ;;  %1372 = vmatprep.subr.bf16.mxu1 %v1532_v1  ;;  %v1537_v6 = vld [vmem:[%s2086_s1 + $0x8] sm:$0xff]   ;;  %v1541_v10 = vld [vmem:[%s2086_s1 + $0x10] sm:$0xff]  }
   0x4   :  { %v1534_v3 = vld [vmem:[%s2086_s1 + $0x80] sm:$0xff]   ;;  %1315 = vmatpush3.bf16.msra.mxu0 %v1533_v2  ;;  %v1538_v7 = vld [vmem:[%s2086_s1 + $0x88] sm:$0xff]   ;;  %v1542_v11 = vld [vmem:[%s2086_s1 + $0x90] sm:$0xff]  }
   0x5   :  { %1373 = vmatpush3.bf16.msra.mxu1 %v1534_v3  ;;  %1316 = vmatprep.subr.bf16.mxu0 %v1535_v4  ;;  %v1543_v12 = vld [vmem:[%s2086_s1 + $0x58] sm:$0xff]   ;;  %v1547_v16 = vld [vmem:[%s2086_s1 + $0x60] sm:$0xff]   ;;  %v1551_v20 = vld [vmem:[%s2086_s1 + $0x68] sm:$0xff]  }
   0x6   :  { %1374 = vmatprep.subr.bf16.mxu1 %v1536_v5  ;;  %v1544_v13 = vld [vmem:[%s2086_s1 + $0xd8] sm:$0xff]   ;;  %v1548_v17 = vld [vmem:[%s2086_s1 + $0xe0] sm:$0xff]   ;;  %v1552_v21 = vld [vmem:[%s2086_s1 + $0xe8] sm:$0xff]  }
   0x7   :  { %v1545_v14 = vld [vmem:[%s2086_s1 + $0x18] sm:$0xff]   ;;  %v1549_v18 = vld [vmem:[%s2086_s1 + $0x20] sm:$0xff]   ;;  %v1553_v22 = vld [vmem:[%s2086_s1 + $0x28] sm:$0xff]  }
   0x8   :  { %1317 = vmatpush3.bf16.msra.mxu0 %v1537_v6  ;;  %v1546_v15 = vld [vmem:[%s2086_s1 + $0x98] sm:$0xff]   ;;  %v1550_v19 = vld [vmem:[%s2086_s1 + $0xa0] sm:$0xff]   ;;  %v1554_v23 = vld [vmem:[%s2086_s1 + $0xa8] sm:$0xff]  }
   0x9   :  { %1375 = vmatpush3.bf16.msra.mxu1 %v1538_v7  ;;  %1318 = vmatprep.subr.bf16.mxu0 %v1539_v8  ;;  %v1555_v24 = vld [vmem:[%s2086_s1 + $0x70] sm:$0xff]   ;;  %v1559_v28 = vld [vmem:[%s2086_s1 + $0x78] sm:$0xff]   ;;  %v1565_v33 = vld [vmem:[%s2087_s0 + $0x4] ss:$28 sps:$4 sm:$0xff]  }
   0xa   :  { %1376 = vmatprep.subr.bf16.mxu1 %v1540_v9  ;;  %v1556_v25 = vld [vmem:[%s2086_s1 + $0xf0] sm:$0xff]   ;;  %v1560_v29 = vld [vmem:[%s2086_s1 + $0xf8] sm:$0xff]   ;;  %v1566_v34 = vld [vmem:[%s2087_s0 + $0x8] ss:$28 sps:$4 sm:$0xff]   ;;  %767 = vmatprep.mubr.bf16.mxu0 %v1565_v33 }
   0xb   :  { %v1557_v26 = vld [vmem:[%s2086_s1 + $0x30] sm:$0xff]   ;;  %v1561_v30 = vld [vmem:[%s2086_s1 + $0x38] sm:$0xff]   ;;  %v1568_v35 = vld [vmem:[%s2087_s0 + $0xc] ss:$28 sps:$4 sm:$0xff]  }
   0xc   :  { %1319 = vmatpush3.bf16.msra.mxu0 %v1541_v10  ;;  %v1558_v27 = vld [vmem:[%s2086_s1 + $0xb0] sm:$0xff]   ;;  %v1562_v31 = vld [vmem:[%s2086_s1 + $0xb8] sm:$0xff]   ;;  %v1569_v37 = vld [vmem:[%s2086_s1 + $0x140] sm:$0xff]   ;;  %856 = vmatprep.mubr.bf16.mxu1 %v1568_v35 }
   0xd   :  { %1377 = vmatpush3.bf16.msra.mxu1 %v1542_v11  ;;  %1320 = vmatprep.subr.bf16.mxu0 %v1543_v12  ;;  %v1563_v32 = vld [vmem:[%s2087_s0] ss:$28 sps:$4 sm:$0xff]   ;;  %v1576_v42 = vld [vmem:[%s2086_s1 + $0x148] sm:$0xff]   ;;  %v1577_v43 = vld [vmem:[%s2087_s0 + $0x38] ss:$28 sps:$4 sm:$0xff]  }
   0xe   :  { %1378 = vmatprep.subr.bf16.mxu1 %v1544_v13  ;;  %v1570_v38 = vld [vmem:[%s2086_s1 + $0x100] sm:$0xff]   ;;  %v1572_v40 = vld [vmem:[%s2087_s0 + $0x3c] ss:$28 sps:$4 sm:$0xff]   ;;  %v1579_v45 = vld [vmem:[%s2086_s1 + $0x108] sm:$0xff]  }
   0xf   :  { %v1571_v39 = vld [vmem:[%s2086_s1 + $0x180] sm:$0xff]   ;;  %v1580_v46 = vld [vmem:[%s2086_s1 + $0x150] sm:$0xff]   ;;  %v1583_v48 = vld [vmem:[%s2087_s0 + $0x7c] ss:$28 sps:$4 sm:$0xff]  }
  0x10   :  { %1321 = vmatpush3.bf16.msra.mxu0 %v1545_v14  ;;  %v1574_v41 = vld [vmem:[%s2087_s0 + $0x44] ss:$28 sps:$4 sm:$0xff]   ;;  %v1581_v47 = vld [vmem:[%s2087_s0 + $0x74] ss:$28 sps:$4 sm:$0xff]   ;;  %v1588_v52 = vld [vmem:[%s2086_s1 + $0x158] sm:$0xff]  }
  0x11   :  { %1379 = vmatpush3.bf16.msra.mxu1 %v1546_v15  ;;  %1322 = vmatprep.subr.bf16.mxu0 %v1547_v16  ;;  %v1578_v44 = vld [vmem:[%s2087_s0 + $0x40] ss:$28 sps:$4 sm:$0xff]   ;;  %v1585_v49 = vld [vmem:[%s2086_s1 + $0x110] sm:$0xff]   ;;  %v1590_v54 = vld [vmem:[%s2087_s0 + $0xac] ss:$28 sps:$4 sm:$0xff]  }
  0x12   :  { %1380 = vmatprep.subr.bf16.mxu1 %v1548_v17  ;;  %v1586_v50 = vld [vmem:[%s2087_s0 + $0x70] ss:$28 sps:$4 sm:$0xff]   ;;  %v1587_v51 = vld [vmem:[%s2087_s0 + $0x78] ss:$28 sps:$4 sm:$0xff]   ;;  %v1596_v56 = vld [vmem:[%s2086_s1 + $0x160] sm:$0xff]  }
  0x13   :  { %v1589_v53 = vld [vmem:[%s2086_s1 + $0x118] sm:$0xff]   ;;  %v1592_v55 = vld [vmem:[%s2087_s0 + $0xb4] ss:$28 sps:$4 sm:$0xff]   ;;  %v1597_v57 = vld [vmem:[%s2086_s1 + $0x120] sm:$0xff]  }
  0x14   :  { %1323 = vmatpush3.bf16.msra.mxu0 %v1549_v18  ;;  %v1594_v58 = vld [vmem:[%s2087_s0 + $0xa8] ss:$28 sps:$4 sm:$0xff]   ;;  %v1595_v59 = vld [vmem:[%s2087_s0 + $0xb0] ss:$28 sps:$4 sm:$0xff]   ;;  %v1602_v1 = vld [vmem:[%s2087_s0 + $0xe0] ss:$28 sps:$4 sm:$0xff]  }
  0x15   :  { %1381 = vmatpush3.bf16.msra.mxu1 %v1550_v19  ;;  %1324 = vmatprep.subr.bf16.mxu0 %v1551_v20  ;;  %v1598_v60 = vld [vmem:[%s2087_s0 + $0xe4] ss:$28 sps:$4 sm:$0xff]   ;;  %v1600_v61 = vld [vmem:[%s2087_s0 + $0xec] ss:$28 sps:$4 sm:$0xff]   ;;  %v1613_v2 = vld [vmem:[%s2086_s1 + $0x170] sm:$0xff]  }
  0x16   :  { %1382 = vmatprep.subr.bf16.mxu1 %v1552_v21  ;;  %v1604_v62 = vld [vmem:[%s2086_s1 + $0x188] sm:$0xff]   ;;  %v1614_v3 = vld [vmem:[%s2086_s1 + $0x130] sm:$0xff]   ;;  %v1607_v5 = vld [vmem:[%s2087_s0 + $0x11c] ss:$28 sps:$4 sm:$0xff]  }
  0x17   :  { %v1605_v63 = vld [vmem:[%s2086_s1 + $0x168] sm:$0xff]   ;;  %v1609_v6 = vld [vmem:[%s2087_s0 + $0x124] ss:$28 sps:$4 sm:$0xff]   ;;  %v1621_v7 = vld [vmem:[%s2086_s1 + $0x178] sm:$0xff]  }
  0x18   :  { %1325 = vmatpush3.bf16.msra.mxu0 %v1553_v22  ;;  %v1606_v0 = vld [vmem:[%s2086_s1 + $0x128] sm:$0xff]   ;;  %v1622_v8 = vld [vmem:[%s2086_s1 + $0x138] sm:$0xff]   ;;  %v1615_v11 = vld [vmem:[%s2087_s0 + $0x154] ss:$28 sps:$4 sm:$0xff]  }
  0x19   :  { %1383 = vmatpush3.bf16.msra.mxu1 %v1554_v23  ;;  %1326 = vmatprep.subr.bf16.mxu0 %v1555_v24  ;;  %v1603_v4 = vld [vmem:[%s2087_s0 + $0xe8] ss:$28 sps:$4 sm:$0xff]   ;;  %v1611_v9 = vld [vmem:[%s2087_s0 + $0x118] ss:$28 sps:$4 sm:$0xff]   ;;  %v1612_v10 = vld [vmem:[%s2087_s0 + $0x120] ss:$28 sps:$4 sm:$0xff]  }
  0x1a   :  { %1384 = vmatprep.subr.bf16.mxu1 %v1556_v25  ;;  %v1617_v12 = vld [vmem:[%s2087_s0 + $0x15c] ss:$28 sps:$4 sm:$0xff]   ;;  %v1619_v13 = vld [vmem:[%s2087_s0 + $0x150] ss:$28 sps:$4 sm:$0xff]   ;;  %v1629_v19 = vld [vmem:[%s2087_s0 + $0x48] ss:$28 sps:$4 sm:$0xff]  }
  0x1b   :  { %v1620_v14 = vld [vmem:[%s2087_s0 + $0x158] ss:$28 sps:$4 sm:$0xff]   ;;  %v1623_v16 = vld [vmem:[%s2087_s0 + $0x10] ss:$28 sps:$4 sm:$0xff]   ;;  %v1631_v21 = vld [vmem:[%s2087_s0 + $0x84] ss:$28 sps:$4 sm:$0xff]  }
  0x1c   :  { %1327 = vmatpush3.bf16.msra.mxu0 %v1557_v26  ;;  %v1625_v15 = vld [vmem:[%s2087_s0 + $0x14] ss:$28 sps:$4 sm:$0xff]   ;;  %v1627_v18 = vld [vmem:[%s2087_s0 + $0x4c] ss:$28 sps:$4 sm:$0xff]   ;;  %v1633_v22 = vld [vmem:[%s2087_s0 + $0x80] ss:$28 sps:$4 sm:$0xff]  }
  0x1d   :  { %1385 = vmatpush3.bf16.msra.mxu1 %v1558_v27  ;;  %1328 = vmatprep.subr.bf16.mxu0 %v1559_v28  ;;  %v1626_v17 = vld [vmem:[%s2087_s0 + $0x18] ss:$28 sps:$4 sm:$0xff]   ;;  %v1630_v20 = vld [vmem:[%s2087_s0 + $0x50] ss:$28 sps:$4 sm:$0xff]   ;;  %v1634_v23 = vld [vmem:[%s2087_s0 + $0x88] ss:$28 sps:$4 sm:$0xff]  }
  0x1e   :  { %1386 = vmatprep.subr.bf16.mxu1 %v1560_v29  ;;  %v1635_v24 = vld [vmem:[%s2087_s0 + $0xbc] ss:$28 sps:$4 sm:$0xff]   ;;  %v1639_v27 = vld [vmem:[%s2087_s0 + $0xf4] ss:$28 sps:$4 sm:$0xff]   ;;  %v1647_v33 = vld [vmem:[%s2087_s0 + $0x164] ss:$28 sps:$4 sm:$0xff]  }
  0x1f   :  { %v1637_v25 = vld [vmem:[%s2087_s0 + $0xb8] ss:$28 sps:$4 sm:$0xff]   ;;  %v1638_v26 = vld [vmem:[%s2087_s0 + $0xc0] ss:$28 sps:$4 sm:$0xff]   ;;  %v1641_v28 = vld [vmem:[%s2087_s0 + $0xf0] ss:$28 sps:$4 sm:$0xff]  }
  0x20   :  { %1329 = vmatpush3.bf16.msra.mxu0 %v1561_v30  ;;  %v1642_v29 = vld [vmem:[%s2087_s0 + $0xf8] ss:$28 sps:$4 sm:$0xff]   ;;  %v1643_v30 = vld [vmem:[%s2087_s0 + $0x12c] ss:$28 sps:$4 sm:$0xff]  }
  0x21   :  { %1387 = vmatpush3.bf16.msra.mxu1 %v1562_v31  ;;  %1430 = vmatprep.subr.bf16.mxu0 %v1569_v37  ;;  %v1645_v31 = vld [vmem:[%s2087_s0 + $0x128] ss:$28 sps:$4 sm:$0xff]  }
  0x22   :  { %1497 = vmatprep.subr.bf16.mxu1 %v1651_v36  ;;  %v1650_v35 = vld [vmem:[%s2087_s0 + $0x168] ss:$28 sps:$4 sm:$0xff]  }
  0x23   :  { %768 = vmatmul.mubr.bf16.vlgmr.msra.gmra.mrb[0].mxu0 %v1563_v32  ;;  %v1646_v32 = vld [vmem:[%s2087_s0 + $0x130] ss:$28 sps:$4 sm:$0xff]  }
  0x24   :  { %857 = vmatmul.mubr.bf16.vlgmr.msra.gmra.mrb[0].mxu1 %v1566_v34  ;;  %1431 = vmatpush3.bf16.msra.mxu0 %v1570_v38  ;;  %v1649_v34 = vld [vmem:[%s2087_s0 + $0x160] ss:$28 sps:$4 sm:$0xff]  }
  0x25   :  { %1498 = vmatpush3.bf16.msra.mxu1 %v1571_v39  ;;  %775 = vmatprep.mubr.bf16.mxu0 %v1572_v40 }
  0x26   :  { %1499 = vmatprep.subr.bf16.mxu1 %v1651_v36  ;;  %864 = vmatprep.mubr.bf16.mxu1 %v1574_v41 }
  0x27   :  { %1432 = vmatprep.subr.bf16.mxu0 %v1576_v42 }
  0x28   :  { %1433 = vmatpush3.bf16.msra.mxu0 %v1579_v45 }
  0x29   :  { %1434 = vmatprep.subr.bf16.mxu0 %v1580_v46  ;;  %1500 = vmatpush3.bf16.msra.mxu1 %v1604_v62 }
  0x2b   :  { %776 = vmatmul.mubr.bf16.gmra.mrb[4].mxu0 %v1577_v43 }
  0x2c   :  { %865 = vmatmul.mubr.bf16.gmra.mrb[4].mxu1 %v1578_v44  ;;  %783 = vmatprep.mubr.bf16.mxu0 %v1581_v47 }
  0x2d   :  { %872 = vmatprep.mubr.bf16.mxu1 %v1583_v48  ;;  %1435 = vmatpush3.bf16.msra.mxu0 %v1585_v49 }
  0x2e   :  { %1436 = vmatprep.subr.bf16.mxu0 %v1588_v52 }
  0x31   :  { %1437 = vmatpush3.bf16.msra.mxu0 %v1589_v53 }
  0x32   :  { %1438 = vmatprep.subr.bf16.mxu0 %v1596_v56 }
  0x33   :  { %784 = vmatmul.mubr.bf16.gmra.mrb[8].mxu0 %v1586_v50 }
  0x34   :  { %873 = vmatmul.mubr.bf16.gmra.mrb[8].mxu1 %v1587_v51  ;;  %791 = vmatprep.mubr.bf16.mxu0 %v1590_v54 }
  0x35   :  { %880 = vmatprep.mubr.bf16.mxu1 %v1592_v55  ;;  %1439 = vmatpush3.bf16.msra.mxu0 %v1597_v57 }
  0x36   :  { %1440 = vmatprep.subr.bf16.mxu0 %v1605_v63 }
  0x39   :  { %1441 = vmatpush3.bf16.msra.mxu0 %v1606_v0 }
  0x3a   :  { %1442 = vmatprep.subr.bf16.mxu0 %v1613_v2 }
  0x3b   :  { %792 = vmatmul.mubr.bf16.gmra.mrb[12].mxu0 %v1594_v58 }
  0x3c   :  { %881 = vmatmul.mubr.bf16.gmra.mrb[12].mxu1 %v1595_v59  ;;  %799 = vmatprep.mubr.bf16.mxu0 %v1598_v60 }
  0x3d   :  { %888 = vmatprep.mubr.bf16.mxu1 %v1600_v61  ;;  %1443 = vmatpush3.bf16.msra.mxu0 %v1614_v3 }
  0x3e   :  { %1444 = vmatprep.subr.bf16.mxu0 %v1621_v7 }
  0x41   :  { %1445 = vmatpush3.bf16.msra.mxu0 %v1622_v8 }
  0x43   :  { %800 = vmatmul.mubr.bf16.gmra.mrb[16].mxu0 %v1602_v1 }
  0x44   :  { %889 = vmatmul.mubr.bf16.gmra.mrb[16].mxu1 %v1603_v4  ;;  %807 = vmatprep.mubr.bf16.mxu0 %v1607_v5 }
  0x45   :  { %896 = vmatprep.mubr.bf16.mxu1 %v1609_v6 }
  0x4b   :  { %808 = vmatmul.mubr.bf16.gmra.mrb[20].mxu0 %v1611_v9 }
  0x4c   :  { %897 = vmatmul.mubr.bf16.gmra.mrb[20].mxu1 %v1612_v10  ;;  %815 = vmatprep.mubr.bf16.mxu0 %v1615_v11 }
  0x4d   :  { %904 = vmatprep.mubr.bf16.mxu1 %v1617_v12 }
  0x53   :  { %816 = vmatmul.mubr.bf16.gmra.mrb[24].mxu0 %v1619_v13 }
  0x54   :  { %905 = vmatmul.mubr.bf16.gmra.mrb[24].mxu1 %v1620_v14  ;;  %945 = vmatprep.mubr.bf16.mxu0 %v1625_v15 }
  0x55   :  { %1501 = vmatprep.mubr.msk.bf16.mxu1 %vm1652_vm0, %v1651_v36 }
  0x5b   :  { %946 = vmatmul.mubr.bf16.vlgmr.msra.gmra.mrb[28].mxu0 %v1623_v16 }
  0x5c   :  { %1502 = vmatmul.mubr.msk.bf16.vlgmr.msra.gmra.mrb[28].mxu1 %vm713_vm1, %v1626_v17  ;;  %953 = vmatprep.mubr.bf16.mxu0 %v1627_v18 }
  0x5d   :  { %1505 = vmatprep.mubr.msk.bf16.mxu1 %vm1652_vm0, %v1651_v36 }
  0x63   :  { %954 = vmatmul.mubr.bf16.gmra.mrb[32].mxu0 %v1629_v19 }
  0x64   :  { %1506 = vmatmul.mubr.msk.bf16.gmra.mrb[32].mxu1 %vm713_vm1, %v1630_v20  ;;  %961 = vmatprep.mubr.bf16.mxu0 %v1631_v21 }
  0x65   :  { %1509 = vmatprep.mubr.msk.bf16.mxu1 %vm1652_vm0, %v1651_v36 }
  0x6b   :  { %962 = vmatmul.mubr.bf16.gmra.mrb[36].mxu0 %v1633_v22 }
  0x6c   :  { %1510 = vmatmul.mubr.msk.bf16.gmra.mrb[36].mxu1 %vm713_vm1, %v1634_v23  ;;  %969 = vmatprep.mubr.bf16.mxu0 %v1635_v24 }
  0x6d   :  { %1513 = vmatprep.mubr.msk.bf16.mxu1 %vm1652_vm0, %v1651_v36 }
  0x73   :  { %970 = vmatmul.mubr.bf16.gmra.mrb[40].mxu0 %v1637_v25 }
  0x74   :  { %1514 = vmatmul.mubr.msk.bf16.gmra.mrb[40].mxu1 %vm713_vm1, %v1638_v26  ;;  %977 = vmatprep.mubr.bf16.mxu0 %v1639_v27 }
  0x75   :  { %1517 = vmatprep.mubr.msk.bf16.mxu1 %vm1652_vm0, %v1651_v36 }
  0x7b   :  { %978 = vmatmul.mubr.bf16.gmra.mrb[44].mxu0 %v1641_v28 }
  0x7c   :  { %1518 = vmatmul.mubr.msk.bf16.gmra.mrb[44].mxu1 %vm713_vm1, %v1642_v29  ;;  %985 = vmatprep.mubr.bf16.mxu0 %v1643_v30 }
  0x7d   :  { %1521 = vmatprep.mubr.msk.bf16.mxu1 %vm1652_vm0, %v1651_v36 }
  0x83   :  { %986 = vmatmul.mubr.bf16.gmra.mrb[48].mxu0 %v1645_v31 }
  0x84   :  { %1522 = vmatmul.mubr.msk.bf16.gmra.mrb[48].mxu1 %vm713_vm1, %v1646_v32  ;;  %993 = vmatprep.mubr.bf16.mxu0 %v1647_v33 }
  0x85   :  { %1525 = vmatprep.mubr.msk.bf16.mxu1 %vm1652_vm0, %v1651_v36 }
  0x8b   :  { %994 = vmatmul.mubr.bf16.gmra.mrb[52].mxu0 %v1649_v34 }
  0x8c   :  { %1526 = vmatmul.mubr.msk.bf16.gmra.mrb[52].mxu1 %vm713_vm1, %v1650_v35 }
  0xf6   :  { %v1330_v37 = vpop.f32.mrb[0].mxu0 }
  0xf7   :  { %v1388_v38 = vpop.f32.mrb[0].mxu1  ;;  %v1331_v39 = vpop.f32.mrb[1].mxu0 }
  0xf8   :  { %v1332_v40 = vadd.f32 %v1331_v39, %v1330_v37  ;;  %v1389_v41 = vpop.f32.mrb[1].mxu1  ;;  %v1333_v42 = vpop.f32.mrb[2].mxu0 }
  0xf9   :  { %v1390_v43 = vadd.f32 %v1389_v41, %v1388_v38  ;;  %v1391_v44 = vpop.f32.mrb[2].mxu1  ;;  %v1334_v36 = vpop.f32.mrb[3].mxu0 }
  0xfa   :  { %v1335_v45 = vadd.f32 %v1334_v36, %v1333_v42  ;;  %v1392_v46 = vpop.f32.mrb[3].mxu1 }
  0xfb   :  { %v1988_v47 = vadd.f32 %v1390_v43, %v1332_v40  ;;  %v1393_v48 = vadd.f32 %v1392_v46, %v1391_v44 }
  0xfd   :  { %v1990_v49 = vadd.f32 %v1393_v48, %v1335_v45 }
  0xfe   :  { %v1336_v50 = vpop.f32.mrb[4].mxu0 }
  0xff   :  { %v1394_v51 = vpop.f32.mrb[4].mxu1  ;;  %v1337_v52 = vpop.f32.mrb[5].mxu0 }
 0x100   :  { %v1338_v53 = vadd.f32 %v1337_v52, %v1336_v50  ;;  %v1395_v54 = vpop.f32.mrb[5].mxu1  ;;  %v1339_v55 = vpop.f32.mrb[6].mxu0 }
 0x101   :  { %v1396_v56 = vadd.f32 %v1395_v54, %v1394_v51  ;;  %v1397_v57 = vpop.f32.mrb[6].mxu1  ;;  %v1340_v58 = vpop.f32.mrb[7].mxu0 }
 0x102   :  { %v1341_v59 = vadd.f32 %v1340_v58, %v1339_v55  ;;  %v1398_v60 = vpop.f32.mrb[7].mxu1 }
 0x103   :  { %v1992_v61 = vadd.f32 %v1396_v56, %v1338_v53  ;;  %v1399_v62 = vadd.f32 %v1398_v60, %v1397_v57 }
 0x105   :  { %v1994_v63 = vadd.f32 %v1399_v62, %v1341_v59 }
 0x106   :  { %v1342_v0 = vpop.f32.mrb[8].mxu0 }
 0x107   :  { %v1400_v1 = vpop.f32.mrb[8].mxu1  ;;  %v1343_v2 = vpop.f32.mrb[9].mxu0 }
 0x108   :  { %v1344_v3 = vadd.f32 %v1343_v2, %v1342_v0  ;;  %v1401_v4 = vpop.f32.mrb[9].mxu1  ;;  %v1345_v5 = vpop.f32.mrb[10].mxu0 }
 0x109   :  { %v1402_v6 = vadd.f32 %v1401_v4, %v1400_v1  ;;  %v1403_v7 = vpop.f32.mrb[10].mxu1  ;;  %v1346_v8 = vpop.f32.mrb[11].mxu0 }
 0x10a   :  { %v1347_v9 = vadd.f32 %v1346_v8, %v1345_v5  ;;  %v1404_v10 = vpop.f32.mrb[11].mxu1 }
 0x10b   :  { %v1996_v11 = vadd.f32 %v1402_v6, %v1344_v3  ;;  %v1405_v12 = vadd.f32 %v1404_v10, %v1403_v7 }
 0x10d   :  { %v1998_v13 = vadd.f32 %v1405_v12, %v1347_v9 }
 0x10e   :  { %v1348_v14 = vpop.f32.mrb[12].mxu0 }
 0x10f   :  { %v1406_v15 = vpop.f32.mrb[12].mxu1  ;;  %v1349_v16 = vpop.f32.mrb[13].mxu0 }
 0x110   :  { %v1350_v17 = vadd.f32 %v1349_v16, %v1348_v14  ;;  %v1407_v18 = vpop.f32.mrb[13].mxu1  ;;  %v1351_v19 = vpop.f32.mrb[14].mxu0 }
 0x111   :  { %v1408_v20 = vadd.f32 %v1407_v18, %v1406_v15  ;;  %v1409_v21 = vpop.f32.mrb[14].mxu1  ;;  %v1352_v22 = vpop.f32.mrb[15].mxu0 }
 0x112   :  { %v1353_v23 = vadd.f32 %v1352_v22, %v1351_v19  ;;  %v1410_v24 = vpop.f32.mrb[15].mxu1 }
 0x113   :  { %v2000_v25 = vadd.f32 %v1408_v20, %v1350_v17  ;;  %v1411_v26 = vadd.f32 %v1410_v24, %v1409_v21 }
 0x115   :  { %v2002_v27 = vadd.f32 %v1411_v26, %v1353_v23 }
 0x116   :  { %v1354_v28 = vpop.f32.mrb[16].mxu0 }
 0x117   :  { %v1412_v29 = vpop.f32.mrb[16].mxu1  ;;  %v1355_v30 = vpop.f32.mrb[17].mxu0 }
 0x118   :  { %v1356_v31 = vadd.f32 %v1355_v30, %v1354_v28  ;;  %v1413_v32 = vpop.f32.mrb[17].mxu1  ;;  %v1357_v33 = vpop.f32.mrb[18].mxu0 }
 0x119   :  { %v1414_v34 = vadd.f32 %v1413_v32, %v1412_v29  ;;  %v1415_v35 = vpop.f32.mrb[18].mxu1  ;;  %v1358_v37 = vpop.f32.mrb[19].mxu0 }
 0x11a   :  { %v1359_v38 = vadd.f32 %v1358_v37, %v1357_v33  ;;  %v1416_v39 = vpop.f32.mrb[19].mxu1 }
 0x11b   :  { %v2004_v40 = vadd.f32 %v1414_v34, %v1356_v31  ;;  %v1417_v41 = vadd.f32 %v1416_v39, %v1415_v35 }
 0x11d   :  { %v2006_v42 = vadd.f32 %v1417_v41, %v1359_v38 }
 0x11e   :  { %v1360_v43 = vpop.f32.mrb[20].mxu0 }
 0x11f   :  { %v1418_v44 = vpop.f32.mrb[20].mxu1  ;;  %v1361_v36 = vpop.f32.mrb[21].mxu0 }
 0x120   :  { %v1362_v45 = vadd.f32 %v1361_v36, %v1360_v43  ;;  %v1419_v46 = vpop.f32.mrb[21].mxu1  ;;  %v1363_v48 = vpop.f32.mrb[22].mxu0 }
 0x121   :  { %v1420_v50 = vadd.f32 %v1419_v46, %v1418_v44  ;;  %v1421_v51 = vpop.f32.mrb[22].mxu1  ;;  %v1364_v52 = vpop.f32.mrb[23].mxu0 }
 0x122   :  { %v1365_v53 = vadd.f32 %v1364_v52, %v1363_v48  ;;  %v1422_v54 = vpop.f32.mrb[23].mxu1 }
 0x123   :  { %v2008_v55 = vadd.f32 %v1420_v50, %v1362_v45  ;;  %v1423_v56 = vadd.f32 %v1422_v54, %v1421_v51 }
 0x125   :  { %v2010_v57 = vadd.f32 %v1423_v56, %v1365_v53 }
 0x126   :  { %v1366_v58 = vpop.f32.mrb[24].mxu0 }
 0x127   :  { %v1424_v59 = vpop.f32.mrb[24].mxu1  ;;  %v1367_v60 = vpop.f32.mrb[25].mxu0 }
 0x128   :  { %v1368_v62 = vadd.f32 %v1367_v60, %v1366_v58  ;;  %v1425_v0 = vpop.f32.mrb[25].mxu1  ;;  %v1369_v1 = vpop.f32.mrb[26].mxu0 }
 0x129   :  { %v1426_v2 = vadd.f32 %v1425_v0, %v1424_v59  ;;  %v1427_v3 = vpop.f32.mrb[26].mxu1  ;;  %v1370_v4 = vpop.f32.mrb[27].mxu0 }
 0x12a   :  { %v1371_v5 = vadd.f32 %v1370_v4, %v1369_v1  ;;  %v1428_v6 = vpop.f32.mrb[27].mxu1 }
 0x12b   :  { %v2012_v7 = vadd.f32 %v1426_v2, %v1368_v62  ;;  %v1429_v8 = vadd.f32 %v1428_v6, %v1427_v3 }
 0x12d   :  { %v2014_v9 = vadd.f32 %v1429_v8, %v1371_v5 }
 0x12e   :  { %v1446_v10 = vpop.f32.mrb[28].mxu0 }
 0x12f   :  { %v1447_v12 = vpop.f32.mrb[29].mxu0  ;;  %v1036_v14 = vpop.f32.mrb[28].mxu1 }
 0x130   :  { %v1448_v15 = vadd.f32 %v1447_v12, %v1446_v10  ;;  %v1449_v16 = vpop.f32.mrb[30].mxu0  ;;  %v1503_v17 = vpop.f32.mrb[29].mxu1 }
 0x131   :  { %v1450_v18 = vpop.f32.mrb[31].mxu0  ;;  %v1039_v19 = vpop.f32.mrb[30].mxu1 }
 0x132   :  { %v1451_v20 = vadd.f32 %v1450_v18, %v1449_v16  ;;  %v948_v21 = vadd.f32 %v1448_v15, %v1988_v47  ;;  %v1504_v22 = vpop.f32.mrb[31].mxu1 }
 0x134   :  { %v1037_v23 = vadd.f32 %v1036_v14, %v948_v21  ;;  %v951_v24 = vadd.f32 %v1451_v20, %v1990_v49 }
 0x136   :  { %v1091_v26 = vmax.f32 %v1037_v23, 0.0  ;;  %v1040_v28 = vadd.f32 %v1039_v19, %v951_v24  ;;  %v1452_v29 = vpop.f32.mrb[32].mxu0 }
 0x137   :  { %v1453_v30 = vpop.f32.mrb[33].mxu0  ;;  %v1044_v31 = vpop.f32.mrb[32].mxu1 }
 0x138   :  { %v1300_v32 = vpack.c.bf16 %v1091_v26, %v1091_v26  ;;  %v1092_v33 = vmax.f32 %v1040_v28, 0.0  ;;  %v1454_v34 = vadd.f32 %v1453_v30, %v1452_v29  ;;  %v1455_v35 = vpop.f32.mrb[34].mxu0  ;;  %v1507_v37 = vpop.f32.mrb[33].mxu1 }
 0x139   :  { %v1456_v38 = vpop.f32.mrb[35].mxu0  ;;  %v1047_v39 = vpop.f32.mrb[34].mxu1 }
 0x13a   :  { %1162 = vst.msk [vmem:[%s2088_s2] sm:$0xf] %vm1161_vm2, %v1300_v32  ;;  %v1301_v47 = vpack.c.bf16 %v1092_v33, %v1092_v33  ;;  %v1457_v49 = vadd.f32 %v1456_v38, %v1455_v35  ;;  %v956_v41 = vadd.f32 %v1454_v34, %v1992_v61  ;;  %v1508_v43 = vpop.f32.mrb[35].mxu1 }
 0x13c   :  { %1163 = vst.msk [vmem:[%s2088_s2 + $0x4] sm:$0xf] %vm1161_vm2, %v1301_v47  ;;  %v1045_v44 = vadd.f32 %v1044_v31, %v956_v41  ;;  %v959_v36 = vadd.f32 %v1457_v49, %v1994_v63 }
 0x13e   :  { %v1093_v45 = vmax.f32 %v1045_v44, 0.0  ;;  %v1048_v46 = vadd.f32 %v1047_v39, %v959_v36  ;;  %v1458_v48 = vpop.f32.mrb[36].mxu0 }
 0x13f   :  { %v1459_v50 = vpop.f32.mrb[37].mxu0  ;;  %v1052_v51 = vpop.f32.mrb[36].mxu1 }
 0x140   :  { %v1302_v52 = vpack.c.bf16 %v1093_v45, %v1093_v45  ;;  %v1094_v53 = vmax.f32 %v1048_v46, 0.0  ;;  %v1460_v54 = vadd.f32 %v1459_v50, %v1458_v48  ;;  %v1461_v56 = vpop.f32.mrb[38].mxu0  ;;  %v1511_v58 = vpop.f32.mrb[37].mxu1 }
 0x141   :  { %v1462_v61 = vpop.f32.mrb[39].mxu0  ;;  %v1055_v59 = vpop.f32.mrb[38].mxu1 }
 0x142   :  { %1164 = vst.msk [vmem:[%s2088_s2 + $0x8] sm:$0xf] %vm1161_vm2, %v1302_v52  ;;  %v1303_v60 = vpack.c.bf16 %v1094_v53, %v1094_v53  ;;  %v1463_v62 = vadd.f32 %v1462_v61, %v1461_v56  ;;  %v964_v63 = vadd.f32 %v1460_v54, %v1996_v11  ;;  %v1512_v0 = vpop.f32.mrb[39].mxu1 }
 0x144   :  { %1165 = vst.msk [vmem:[%s2088_s2 + $0xc] sm:$0xf] %vm1161_vm2, %v1303_v60  ;;  %v1053_v1 = vadd.f32 %v1052_v51, %v964_v63  ;;  %v967_v2 = vadd.f32 %v1463_v62, %v1998_v13 }
 0x146   :  { %v1095_v3 = vmax.f32 %v1053_v1, 0.0  ;;  %v1056_v4 = vadd.f32 %v1055_v59, %v967_v2  ;;  %v1464_v5 = vpop.f32.mrb[40].mxu0 }
 0x147   :  { %v1465_v6 = vpop.f32.mrb[41].mxu0  ;;  %v1060_v8 = vpop.f32.mrb[40].mxu1 }
 0x148   :  { %v1304_v10 = vpack.c.bf16 %v1095_v3, %v1095_v3  ;;  %v1096_v12 = vmax.f32 %v1056_v4, 0.0  ;;  %v1466_v14 = vadd.f32 %v1465_v6, %v1464_v5  ;;  %v1467_v15 = vpop.f32.mrb[42].mxu0  ;;  %v1515_v16 = vpop.f32.mrb[41].mxu1 }
 0x149   :  { %v1468_v11 = vpop.f32.mrb[43].mxu0  ;;  %v1063_v17 = vpop.f32.mrb[42].mxu1 }
 0x14a   :  { %1166 = vst.msk [vmem:[%s2088_s2 + $0x10] sm:$0xf] %vm1161_vm2, %v1304_v10  ;;  %v1305_v18 = vpack.c.bf16 %v1096_v12, %v1096_v12  ;;  %v1469_v19 = vadd.f32 %v1468_v11, %v1467_v15  ;;  %v972_v13 = vadd.f32 %v1466_v14, %v2000_v25  ;;  %v1516_v20 = vpop.f32.mrb[43].mxu1 }
 0x14c   :  { %1167 = vst.msk [vmem:[%s2088_s2 + $0x14] sm:$0xf] %vm1161_vm2, %v1305_v18  ;;  %v1061_v21 = vadd.f32 %v1060_v8, %v972_v13  ;;  %v975_v22 = vadd.f32 %v1469_v19, %v2002_v27 }
 0x14e   :  { %v1097_v23 = vmax.f32 %v1061_v21, 0.0  ;;  %v1064_v24 = vadd.f32 %v1063_v17, %v975_v22  ;;  %v1470_v26 = vpop.f32.mrb[44].mxu0 }
 0x14f   :  { %v1471_v28 = vpop.f32.mrb[45].mxu0  ;;  %v1068_v29 = vpop.f32.mrb[44].mxu1 }
 0x150   :  { %v1306_v30 = vpack.c.bf16 %v1097_v23, %v1097_v23  ;;  %v1098_v31 = vmax.f32 %v1064_v24, 0.0  ;;  %v1472_v32 = vadd.f32 %v1471_v28, %v1470_v26  ;;  %v1473_v33 = vpop.f32.mrb[46].mxu0  ;;  %v1519_v34 = vpop.f32.mrb[45].mxu1 }
 0x151   :  { %v1474_v25 = vpop.f32.mrb[47].mxu0  ;;  %v1071_v35 = vpop.f32.mrb[46].mxu1 }
 0x152   :  { %1168 = vst.msk [vmem:[%s2088_s2 + $0x18] sm:$0xf] %vm1161_vm2, %v1306_v30  ;;  %v1307_v37 = vpack.c.bf16 %v1098_v31, %v1098_v31  ;;  %v1475_v38 = vadd.f32 %v1474_v25, %v1473_v33  ;;  %v980_v27 = vadd.f32 %v1472_v32, %v2004_v40  ;;  %v1520_v39 = vpop.f32.mrb[47].mxu1 }
 0x154   :  { %1169 = vst.msk [vmem:[%s2088_s2 + $0x1c] sm:$0xf] %vm1161_vm2, %v1307_v37  ;;  %v1069_v47 = vadd.f32 %v1068_v29, %v980_v27  ;;  %v983_v49 = vadd.f32 %v1475_v38, %v2006_v42 }
 0x156   :  { %v1099_v41 = vmax.f32 %v1069_v47, 0.0  ;;  %v1072_v43 = vadd.f32 %v1071_v35, %v983_v49  ;;  %v1476_v44 = vpop.f32.mrb[48].mxu0 }
 0x157   :  { %v1477_v36 = vpop.f32.mrb[49].mxu0  ;;  %v1076_v45 = vpop.f32.mrb[48].mxu1 }
 0x158   :  { %v1308_v46 = vpack.c.bf16 %v1099_v41, %v1099_v41  ;;  %v1100_v48 = vmax.f32 %v1072_v43, 0.0  ;;  %v1478_v50 = vadd.f32 %v1477_v36, %v1476_v44  ;;  %v1479_v51 = vpop.f32.mrb[50].mxu0  ;;  %v1523_v52 = vpop.f32.mrb[49].mxu1 }
 0x159   :  { %v1480_v40 = vpop.f32.mrb[51].mxu0  ;;  %v1079_v53 = vpop.f32.mrb[50].mxu1 }
 0x15a   :  { %1170 = vst.msk [vmem:[%s2088_s2 + $0x20] sm:$0xf] %vm1161_vm2, %v1308_v46  ;;  %v1309_v54 = vpack.c.bf16 %v1100_v48, %v1100_v48  ;;  %v1481_v56 = vadd.f32 %v1480_v40, %v1479_v51  ;;  %v988_v42 = vadd.f32 %v1478_v50, %v2008_v55  ;;  %v1524_v58 = vpop.f32.mrb[51].mxu1 }
 0x15c   :  { %1171 = vst.msk [vmem:[%s2088_s2 + $0x24] sm:$0xf] %vm1161_vm2, %v1309_v54  ;;  %v1077_v61 = vadd.f32 %v1076_v45, %v988_v42  ;;  %v991_v59 = vadd.f32 %v1481_v56, %v2010_v57 }
 0x15e   :  { %v1101_v60 = vmax.f32 %v1077_v61, 0.0  ;;  %v1080_v62 = vadd.f32 %v1079_v53, %v991_v59  ;;  %v1482_v63 = vpop.f32.mrb[52].mxu0 }
 0x15f   :  { %v1483_v0 = vpop.f32.mrb[53].mxu0  ;;  %v1084_v1 = vpop.f32.mrb[52].mxu1 }
 0x160   :  { %v1310_v2 = vpack.c.bf16 %v1101_v60, %v1101_v60  ;;  %v1102_v3 = vmax.f32 %v1080_v62, 0.0  ;;  %v1484_v4 = vadd.f32 %v1483_v0, %v1482_v63  ;;  %v1485_v5 = vpop.f32.mrb[54].mxu0  ;;  %v1527_v6 = vpop.f32.mrb[53].mxu1 }
 0x161   :  { %v1486_v55 = vpop.f32.mrb[55].mxu0  ;;  %v1087_v8 = vpop.f32.mrb[54].mxu1 }
 0x162   :  { %1172 = vst.msk [vmem:[%s2088_s2 + $0x28] sm:$0xf] %vm1161_vm2, %v1310_v2  ;;  %v1311_v10 = vpack.c.bf16 %v1102_v3, %v1102_v3  ;;  %v1487_v12 = vadd.f32 %v1486_v55, %v1485_v5  ;;  %v996_v57 = vadd.f32 %v1484_v4, %v2012_v7  ;;  %v1528_v14 = vpop.f32.mrb[55].mxu1 }
 0x164   :  { %1173 = vst.msk [vmem:[%s2088_s2 + $0x2c] sm:$0xf] %vm1161_vm2, %v1311_v10  ;;  %v1085_v15 = vadd.f32 %v1084_v1, %v996_v57  ;;  %v999_v16 = vadd.f32 %v1487_v12, %v2014_v9 }
 0x166   :  { %v1103_v11 = vmax.f32 %v1085_v15, 0.0  ;;  %v1088_v17 = vadd.f32 %v1087_v8, %v999_v16 }
 0x168   :  { %v1312_v18 = vpack.c.bf16 %v1103_v11, %v1103_v11  ;;  %v1104_v19 = vmax.f32 %v1088_v17, 0.0 }
 0x16a   :  { %1174 = vst.msk [vmem:[%s2088_s2 + $0x30] sm:$0xf] %vm1161_vm2, %v1312_v18  ;;  %v1313_v13 = vpack.c.bf16 %v1104_v19, %v1104_v19 }
 0x16c   :  { %1175 = vst.msk [vmem:[%s2088_s2 + $0x34] sm:$0xf] %vm1161_vm2, %v1313_v13 }

// kernel: forward.8
= control target key start
LH: loop header
LB: loop body
LE: loop exit
PB: predicated region body
PF: predicated region fallthrough
CT: control target
= control target key end

     0   :  { %v806_v39 = vmov 0.0   ;;  %vm807_vm0 = vmmov 0   ;;  %vm440_vm1 = vcmask 261120   ;;  %vm606_vm2 = vcmask 519168   ;;  %s988_s1 = inlined_call_operand.vmem [shape: bf16[800,64], index: 1, kind: input, shape index: {}]   ;;  %s989_s0 = inlined_call_operand.vmem [shape: bf16[8,800], index: 0, kind: input, shape index: {}]   ;;  %s990_s2 = inlined_call_operand.vmem [shape: bf16[8,64], index: 2, kind: output, shape index: {}]  }
   0x1   :  { %v749_v0 = vld [vmem:[%s988_s1 + $0x40] sm:$0xff]   ;;  %v753_v4 = vld [vmem:[%s988_s1 + $0x48] sm:$0xff]   ;;  %v757_v8 = vld [vmem:[%s988_s1 + $0x50] sm:$0xff]  }
   0x2   :  { %v750_v1 = vld [vmem:[%s988_s1 + $0xc0] sm:$0xff]   ;;  %670 = vmatprep.subr.bf16.mxu0 %v749_v0  ;;  %v754_v5 = vld [vmem:[%s988_s1 + $0xc8] sm:$0xff]   ;;  %v758_v9 = vld [vmem:[%s988_s1 + $0xd0] sm:$0xff]  }
   0x3   :  { %v751_v2 = vld [vmem:[%s988_s1] sm:$0xff]   ;;  %692 = vmatprep.subr.bf16.mxu1 %v750_v1  ;;  %v755_v6 = vld [vmem:[%s988_s1 + $0x8] sm:$0xff]   ;;  %v759_v10 = vld [vmem:[%s988_s1 + $0x10] sm:$0xff]  }
   0x4   :  { %v752_v3 = vld [vmem:[%s988_s1 + $0x80] sm:$0xff]   ;;  %671 = vmatpush3.bf16.msra.mxu0 %v751_v2  ;;  %v756_v7 = vld [vmem:[%s988_s1 + $0x88] sm:$0xff]   ;;  %v760_v11 = vld [vmem:[%s988_s1 + $0x90] sm:$0xff]  }
   0x5   :  { %693 = vmatpush3.bf16.msra.mxu1 %v752_v3  ;;  %672 = vmatprep.subr.bf16.mxu0 %v753_v4  ;;  %v761_v12 = vld [vmem:[%s988_s1 + $0x58] sm:$0xff]   ;;  %v765_v16 = vld [vmem:[%s988_s1 + $0x60] sm:$0xff]   ;;  %v769_v20 = vld [vmem:[%s988_s1 + $0x68] sm:$0xff]  }
   0x6   :  { %694 = vmatprep.subr.bf16.mxu1 %v754_v5  ;;  %v762_v13 = vld [vmem:[%s988_s1 + $0xd8] sm:$0xff]   ;;  %v766_v17 = vld [vmem:[%s988_s1 + $0xe0] sm:$0xff]   ;;  %v770_v21 = vld [vmem:[%s988_s1 + $0xe8] sm:$0xff]  }
   0x7   :  { %v763_v14 = vld [vmem:[%s988_s1 + $0x18] sm:$0xff]   ;;  %v767_v18 = vld [vmem:[%s988_s1 + $0x20] sm:$0xff]   ;;  %v771_v22 = vld [vmem:[%s988_s1 + $0x28] sm:$0xff]  }
   0x8   :  { %673 = vmatpush3.bf16.msra.mxu0 %v755_v6  ;;  %v764_v15 = vld [vmem:[%s988_s1 + $0x98] sm:$0xff]   ;;  %v768_v19 = vld [vmem:[%s988_s1 + $0xa0] sm:$0xff]   ;;  %v772_v23 = vld [vmem:[%s988_s1 + $0xa8] sm:$0xff]  }
   0x9   :  { %695 = vmatpush3.bf16.msra.mxu1 %v756_v7  ;;  %674 = vmatprep.subr.bf16.mxu0 %v757_v8  ;;  %v773_v24 = vld [vmem:[%s988_s1 + $0x70] sm:$0xff]   ;;  %v777_v28 = vld [vmem:[%s988_s1 + $0x78] sm:$0xff]   ;;  %v12_v32 = vld [vmem:[%s989_s0] sm:$0xff] }
   0xa   :  { %696 = vmatprep.subr.bf16.mxu1 %v758_v9  ;;  %v774_v25 = vld [vmem:[%s988_s1 + $0xf0] sm:$0xff]   ;;  %v778_v29 = vld [vmem:[%s988_s1 + $0xf8] sm:$0xff]   ;;  %v612_v33 = vcombine.low %v12_v32, %v12_v32  ;;  %v613_v34 = vcombine.high %v12_v32, %v12_v32  ;;  %v13_v35 = vld [vmem:[%s989_s0 + $0x8] sm:$0xff] }
   0xb   :  { %v775_v26 = vld [vmem:[%s988_s1 + $0x30] sm:$0xff]   ;;  %v779_v30 = vld [vmem:[%s988_s1 + $0x38] sm:$0xff]   ;;  %v614_v36 = vcombine.low %v13_v35, %v13_v35  ;;  %v615_v37 = vcombine.high %v13_v35, %v13_v35  ;;  %v786_v38 = vld [vmem:[%s988_s1 + $0x140] sm:$0xff]  }
   0xc   :  { %675 = vmatpush3.bf16.msra.mxu0 %v759_v10  ;;  %v776_v27 = vld [vmem:[%s988_s1 + $0xb0] sm:$0xff]   ;;  %v780_v31 = vld [vmem:[%s988_s1 + $0xb8] sm:$0xff]   ;;  %476 = vmatprep.mubr.bf16.mxu0 %v613_v34  ;;  %v787_v40 = vld [vmem:[%s988_s1 + $0x100] sm:$0xff]  }
   0xd   :  { %697 = vmatpush3.bf16.msra.mxu1 %v760_v11  ;;  %676 = vmatprep.subr.bf16.mxu0 %v761_v12  ;;  %v788_v41 = vld [vmem:[%s988_s1 + $0x148] sm:$0xff]   ;;  %v790_v43 = vld [vmem:[%s988_s1 + $0x150] sm:$0xff]   ;;  %v792_v45 = vld [vmem:[%s988_s1 + $0x158] sm:$0xff]  }
   0xe   :  { %698 = vmatprep.subr.bf16.mxu1 %v762_v13  ;;  %516 = vmatprep.mubr.bf16.mxu1 %v615_v37  ;;  %v789_v42 = vld [vmem:[%s988_s1 + $0x108] sm:$0xff]   ;;  %v791_v44 = vld [vmem:[%s988_s1 + $0x110] sm:$0xff]   ;;  %v793_v46 = vld [vmem:[%s988_s1 + $0x118] sm:$0xff]  }
   0xf   :  { %v794_v47 = vld [vmem:[%s988_s1 + $0x160] sm:$0xff]   ;;  %v14_v50 = vld [vmem:[%s989_s0 + $0x10] sm:$0xff]  ;;  %v796_v51 = vld [vmem:[%s988_s1 + $0x168] sm:$0xff]  }
  0x10   :  { %677 = vmatpush3.bf16.msra.mxu0 %v763_v14  ;;  %v800_v48 = vld [vmem:[%s988_s1 + $0x180] sm:$0xff]   ;;  %v617_v52 = vcombine.high %v14_v50, %v14_v50  ;;  %v805_v53 = vld [vmem:[%s988_s1 + $0x188] sm:$0xff]   ;;  %v783_v54 = vld [vmem:[%s989_s0 + $0x18] ss:$0 sps:$4 sm:$0xff]   ;;  %v616_v60 = vcombine.low %v14_v50, %v14_v50 }
  0x11   :  { %699 = vmatpush3.bf16.msra.mxu1 %v764_v15  ;;  %678 = vmatprep.subr.bf16.mxu0 %v765_v16  ;;  %v795_v49 = vld [vmem:[%s988_s1 + $0x120] sm:$0xff]   ;;  %v797_v55 = vld [vmem:[%s988_s1 + $0x128] sm:$0xff]   ;;  %v798_v56 = vld [vmem:[%s988_s1 + $0x170] sm:$0xff]  }
  0x12   :  { %700 = vmatprep.subr.bf16.mxu1 %v766_v17  ;;  %v799_v57 = vld [vmem:[%s988_s1 + $0x130] sm:$0xff]   ;;  %v801_v58 = vld [vmem:[%s988_s1 + $0x178] sm:$0xff]  }
  0x13   :  { %v802_v59 = vld [vmem:[%s988_s1 + $0x138] sm:$0xff]  }
  0x14   :  { %679 = vmatpush3.bf16.msra.mxu0 %v767_v18 }
  0x15   :  { %701 = vmatpush3.bf16.msra.mxu1 %v768_v19  ;;  %680 = vmatprep.subr.bf16.mxu0 %v769_v20 }
  0x16   :  { %702 = vmatprep.subr.bf16.mxu1 %v770_v21 }
  0x18   :  { %681 = vmatpush3.bf16.msra.mxu0 %v771_v22 }
  0x19   :  { %703 = vmatpush3.bf16.msra.mxu1 %v772_v23  ;;  %682 = vmatprep.subr.bf16.mxu0 %v773_v24 }
  0x1a   :  { %704 = vmatprep.subr.bf16.mxu1 %v774_v25 }
  0x1c   :  { %683 = vmatpush3.bf16.msra.mxu0 %v775_v26 }
  0x1d   :  { %705 = vmatpush3.bf16.msra.mxu1 %v776_v27  ;;  %684 = vmatprep.subr.bf16.mxu0 %v777_v28 }
  0x1e   :  { %706 = vmatprep.subr.bf16.mxu1 %v778_v29 }
  0x20   :  { %685 = vmatpush3.bf16.msra.mxu0 %v779_v30 }
  0x21   :  { %707 = vmatpush3.bf16.msra.mxu1 %v780_v31  ;;  %714 = vmatprep.subr.bf16.mxu0 %v786_v38 }
  0x22   :  { %739 = vmatprep.subr.bf16.mxu1 %v806_v39 }
  0x23   :  { %477 = vmatmul.mubr.bf16.vlgmr.msra.gmra.mrb[0].mxu0 %v612_v33 }
  0x24   :  { %517 = vmatmul.mubr.bf16.vlgmr.msra.gmra.mrb[0].mxu1 %v614_v36  ;;  %715 = vmatpush3.bf16.msra.mxu0 %v787_v40 }
  0x25   :  { %743 = vmatprep.mubr.msk.bf16.mxu1 %vm807_vm0, %v806_v39  ;;  %716 = vmatprep.subr.bf16.mxu0 %v788_v41 }
  0x26   :  { %740 = vmatpush3.bf16.msra.mxu1 %v800_v48  ;;  %556 = vmatprep.mubr.bf16.mxu0 %v617_v52 }
  0x27   :  { %741 = vmatprep.subr.bf16.mxu1 %v806_v39 }
  0x28   :  { %717 = vmatpush3.bf16.msra.mxu0 %v789_v42 }
  0x29   :  { %718 = vmatprep.subr.bf16.mxu0 %v790_v43 }
  0x2a   :  { %742 = vmatpush3.bf16.msra.mxu1 %v805_v53 }
  0x2c   :  { %719 = vmatpush3.bf16.msra.mxu0 %v791_v44 }
  0x2d   :  { %720 = vmatprep.subr.bf16.mxu0 %v792_v45  ;;  %744 = vmatmul.mubr.msk.bf16.vlgmr.msra.gmra.mrb[4].mxu1 %vm440_vm1, %v783_v54 }
  0x30   :  { %721 = vmatpush3.bf16.msra.mxu0 %v793_v46 }
  0x31   :  { %722 = vmatprep.subr.bf16.mxu0 %v794_v47 }
  0x34   :  { %723 = vmatpush3.bf16.msra.mxu0 %v795_v49 }
  0x35   :  { %724 = vmatprep.subr.bf16.mxu0 %v796_v51 }
  0x38   :  { %725 = vmatpush3.bf16.msra.mxu0 %v797_v55 }
  0x39   :  { %726 = vmatprep.subr.bf16.mxu0 %v798_v56 }
  0x3c   :  { %727 = vmatpush3.bf16.msra.mxu0 %v799_v57 }
  0x3d   :  { %728 = vmatprep.subr.bf16.mxu0 %v801_v58 }
  0x40   :  { %729 = vmatpush3.bf16.msra.mxu0 %v802_v59 }
  0x43   :  { %557 = vmatmul.mubr.bf16.vlgmr.msra.gmra.mrb[4].mxu0 %v616_v60 }
  0xf6   :  { %v686_v61 = vpop.f32.mrb[0].mxu0 }
  0xf7   :  { %v708_v62 = vpop.f32.mrb[0].mxu1  ;;  %v687_v63 = vpop.f32.mrb[1].mxu0 }
  0xf8   :  { %v688_v0 = vadd.f32 %v687_v63, %v686_v61  ;;  %v709_v1 = vpop.f32.mrb[1].mxu1  ;;  %v689_v2 = vpop.f32.mrb[2].mxu0 }
  0xf9   :  { %v710_v3 = vadd.f32 %v709_v1, %v708_v62  ;;  %v690_v4 = vpop.f32.mrb[3].mxu0  ;;  %v711_v5 = vpop.f32.mrb[2].mxu1 }
  0xfa   :  { %v712_v6 = vpop.f32.mrb[3].mxu1 }
  0xfb   :  { %v519_v7 = vadd.f32 %v710_v3, %v688_v0 }
 0x100   :  { %v598_v8 = vpop.f32.mrb[4].mxu1 }
 0x101   :  { %v745_v9 = vpop.f32.mrb[5].mxu1 }
 0x102   :  { %v601_v10 = vpop.f32.mrb[6].mxu1 }
 0x103   :  { %v746_v11 = vpop.f32.mrb[7].mxu1 }
 0x116   :  { %v730_v12 = vpop.f32.mrb[4].mxu0 }
 0x117   :  { %v731_v13 = vpop.f32.mrb[5].mxu0 }
 0x118   :  { %v732_v14 = vadd.f32 %v731_v13, %v730_v12  ;;  %v733_v15 = vpop.f32.mrb[6].mxu0 }
 0x119   :  { %v734_v16 = vpop.f32.mrb[7].mxu0 }
 0x11a   :  { %v559_v17 = vadd.f32 %v732_v14, %v519_v7 }
 0x11c   :  { %v599_v18 = vadd.f32 %v598_v8, %v559_v17 }
 0x11e   :  { %v604_v19 = vmax.f32 %v599_v18, 0.0 }
 0x120   :  { %v605_v20 = vpack.c.bf16 %v604_v19, %v604_v19 }
 0x122   :  { %607 = vst.msk [vmem:[%s990_s2] sm:$0xf] %vm606_vm2, %v605_v20 }

// kernel: forward.9
= control target key start
LH: loop header
LB: loop body
LE: loop exit
PB: predicated region body
PF: predicated region fallthrough
CT: control target
= control target key end

     0   :  { %s1229_s1 = inlined_call_operand.vmem [shape: bf16[256,256], index: 1, kind: input, shape index: {}]   ;;  %s1230_s0 = inlined_call_operand.vmem [shape: bf16[8,256], index: 0, kind: input, shape index: {}]   ;;  %s1231_s3 = inlined_call_operand.vmem [shape: bf16[256,256], index: 3, kind: input, shape index: {}]   ;;  %s1232_s5 = inlined_call_operand.vmem [shape: bf16[256,128], index: 5, kind: input, shape index: {}]   ;;  %s1233_s2 = inlined_call_operand.vmem [shape: f32[1,256], index: 2, kind: input, shape index: {}]   ;;  %s1234_s4 = inlined_call_operand.vmem [shape: f32[1,256], index: 4, kind: input, shape index: {}]   ;;  %s1235_s6 = inlined_call_operand.vmem [shape: f32[1,128], index: 6, kind: input, shape index: {}]   ;;  %s1236_s7 = inlined_call_operand.vmem [shape: f32[8,128], index: 7, kind: output, shape index: {}]  }
   0x1   :  { %v814_v0 = vld [vmem:[%s1229_s1 + $0x4] ss:$8 sps:$4 sm:$0xff]   ;;  %v816_v1 = vld [vmem:[%s1229_s1] ss:$8 sps:$4 sm:$0xff]   ;;  %v817_v2 = vld [vmem:[%s1229_s1 + $0x14] ss:$8 sps:$4 sm:$0xff]  }
   0x2   :  { %239 = vmatprep.subr.bf16.mxu0 %v814_v0  ;;  %v819_v3 = vld [vmem:[%s1229_s1 + $0x10] ss:$8 sps:$4 sm:$0xff]   ;;  %v820_v4 = vld [vmem:[%s1229_s1 + $0x24] ss:$8 sps:$4 sm:$0xff]   ;;  %v822_v5 = vld [vmem:[%s1229_s1 + $0x20] ss:$8 sps:$4 sm:$0xff]  }
   0x3   :  { %240 = vmatpush1.bf16.msra.mxu0 %v816_v1  ;;  %v823_v6 = vld [vmem:[%s1229_s1 + $0x34] ss:$8 sps:$4 sm:$0xff]   ;;  %v825_v7 = vld [vmem:[%s1229_s1 + $0x30] ss:$8 sps:$4 sm:$0xff]   ;;  %v826_v8 = vld [vmem:[%s1229_s1 + $0x44] ss:$8 sps:$4 sm:$0xff]  }
   0x4   :  { %241 = vmatprep.subr.bf16.mxu0 %v817_v2  ;;  %v828_v9 = vld [vmem:[%s1229_s1 + $0x40] ss:$8 sps:$4 sm:$0xff]   ;;  %v829_v10 = vld [vmem:[%s1229_s1 + $0x54] ss:$8 sps:$4 sm:$0xff]   ;;  %v831_v11 = vld [vmem:[%s1229_s1 + $0x50] ss:$8 sps:$4 sm:$0xff]  }
   0x5   :  { %v832_v12 = vld [vmem:[%s1229_s1 + $0x64] ss:$8 sps:$4 sm:$0xff]   ;;  %v834_v13 = vld [vmem:[%s1229_s1 + $0x60] ss:$8 sps:$4 sm:$0xff]   ;;  %v867_v18 = vld [vmem:[%s1231_s3 + $0x14] ss:$8 sps:$4 sm:$0xff]  }
   0x6   :  { %v1013_v14 = vld [vmem:[%s1230_s0] sm:$0xff]  ;;  %v835_v19 = vld [vmem:[%s1229_s1 + $0x74] ss:$8 sps:$4 sm:$0xff]   ;;  %v837_v20 = vld [vmem:[%s1229_s1 + $0x70] ss:$8 sps:$4 sm:$0xff]  }
   0x7   :  { %242 = vmatpush1.bf16.msra.mxu0 %v819_v3  ;;  %v710_v15 = vcombine.high %v1013_v14, %v1013_v14  ;;  %v864_v16 = vld [vmem:[%s1231_s3 + $0x4] ss:$8 sps:$4 sm:$0xff]   ;;  %v866_v17 = vld [vmem:[%s1231_s3] ss:$8 sps:$4 sm:$0xff]   ;;  %v869_v21 = vld [vmem:[%s1231_s3 + $0x10] ss:$8 sps:$4 sm:$0xff]   ;;  %v709_v55 = vcombine.low %v1013_v14, %v1013_v14 }
   0x8   :  { %243 = vmatprep.subr.bf16.mxu0 %v820_v4  ;;  %486 = vmatprep.subr.bf16.mxu1 %v864_v16  ;;  %v870_v22 = vld [vmem:[%s1231_s3 + $0x24] ss:$8 sps:$4 sm:$0xff]   ;;  %v840_v24 = vld [vmem:[%s1229_s1 + $0x80] ss:$8 sps:$4 sm:$0xff]   ;;  %v873_v26 = vld [vmem:[%s1231_s3 + $0x34] ss:$8 sps:$4 sm:$0xff]   ;;  %v62_v16 = vlaneseq }
   0x9   :  { %271 = vmatprep.mubr.bf16.mxu0 %v710_v15  ;;  %487 = vmatpush1.bf16.msra.mxu1 %v866_v17  ;;  %v838_v23 = vld [vmem:[%s1229_s1 + $0x84] ss:$8 sps:$4 sm:$0xff]   ;;  %v872_v25 = vld [vmem:[%s1231_s3 + $0x20] ss:$8 sps:$4 sm:$0xff]   ;;  %v841_v27 = vld [vmem:[%s1229_s1 + $0x94] ss:$8 sps:$4 sm:$0xff]  }
   0xa   :  { %488 = vmatprep.subr.bf16.mxu1 %v867_v18  ;;  %v843_v28 = vld [vmem:[%s1229_s1 + $0x90] ss:$8 sps:$4 sm:$0xff]   ;;  %v876_v30 = vld [vmem:[%s1231_s3 + $0x44] ss:$8 sps:$4 sm:$0xff]   ;;  %v846_v32 = vld [vmem:[%s1229_s1 + $0xa0] ss:$8 sps:$4 sm:$0xff]  }
   0xb   :  { %244 = vmatpush1.bf16.msra.mxu0 %v822_v5  ;;  %v875_v29 = vld [vmem:[%s1231_s3 + $0x30] ss:$8 sps:$4 sm:$0xff]   ;;  %v844_v31 = vld [vmem:[%s1229_s1 + $0xa4] ss:$8 sps:$4 sm:$0xff]   ;;  %v878_v33 = vld [vmem:[%s1231_s3 + $0x40] ss:$8 sps:$4 sm:$0xff]  }
   0xc   :  { %245 = vmatprep.subr.bf16.mxu0 %v823_v6  ;;  %v879_v34 = vld [vmem:[%s1231_s3 + $0x54] ss:$8 sps:$4 sm:$0xff]   ;;  %v881_v36 = vld [vmem:[%s1231_s3 + $0x50] ss:$8 sps:$4 sm:$0xff]   ;;  %v882_v38 = vld [vmem:[%s1231_s3 + $0x64] ss:$8 sps:$4 sm:$0xff]  }
   0xd   :  { %489 = vmatpush1.bf16.msra.mxu1 %v869_v21  ;;  %v847_v35 = vld [vmem:[%s1229_s1 + $0xb4] ss:$8 sps:$4 sm:$0xff]   ;;  %v849_v37 = vld [vmem:[%s1229_s1 + $0xb0] ss:$8 sps:$4 sm:$0xff]   ;;  %v850_v39 = vld [vmem:[%s1229_s1 + $0xc4] ss:$8 sps:$4 sm:$0xff]  }
   0xe   :  { %490 = vmatprep.subr.bf16.mxu1 %v870_v22  ;;  %v884_v40 = vld [vmem:[%s1231_s3 + $0x60] ss:$8 sps:$4 sm:$0xff]   ;;  %v885_v42 = vld [vmem:[%s1231_s3 + $0x74] ss:$8 sps:$4 sm:$0xff]   ;;  %v887_v44 = vld [vmem:[%s1231_s3 + $0x70] ss:$8 sps:$4 sm:$0xff]  }
   0xf   :  { %246 = vmatpush1.bf16.msra.mxu0 %v825_v7  ;;  %v852_v41 = vld [vmem:[%s1229_s1 + $0xc0] ss:$8 sps:$4 sm:$0xff]   ;;  %v853_v43 = vld [vmem:[%s1229_s1 + $0xd4] ss:$8 sps:$4 sm:$0xff]   ;;  %v855_v45 = vld [vmem:[%s1229_s1 + $0xd0] ss:$8 sps:$4 sm:$0xff]  }
  0x10   :  { %247 = vmatprep.subr.bf16.mxu0 %v826_v8  ;;  %v888_v46 = vld [vmem:[%s1231_s3 + $0x84] ss:$8 sps:$4 sm:$0xff]   ;;  %v890_v48 = vld [vmem:[%s1231_s3 + $0x80] ss:$8 sps:$4 sm:$0xff]   ;;  %v891_v50 = vld [vmem:[%s1231_s3 + $0x94] ss:$8 sps:$4 sm:$0xff]  }
  0x11   :  { %491 = vmatpush1.bf16.msra.mxu1 %v872_v25  ;;  %v856_v47 = vld [vmem:[%s1229_s1 + $0xe4] ss:$8 sps:$4 sm:$0xff]   ;;  %v858_v49 = vld [vmem:[%s1229_s1 + $0xe0] ss:$8 sps:$4 sm:$0xff]   ;;  %v859_v51 = vld [vmem:[%s1229_s1 + $0xf4] ss:$8 sps:$4 sm:$0xff]  }
  0x12   :  { %492 = vmatprep.subr.bf16.mxu1 %v873_v26  ;;  %v893_v52 = vld [vmem:[%s1231_s3 + $0x90] ss:$8 sps:$4 sm:$0xff]   ;;  %v894_v54 = vld [vmem:[%s1231_s3 + $0xa4] ss:$8 sps:$4 sm:$0xff]   ;;  %v896_v56 = vld [vmem:[%s1231_s3 + $0xa0] ss:$8 sps:$4 sm:$0xff]  }
  0x13   :  { %248 = vmatpush1.bf16.msra.mxu0 %v828_v9  ;;  %v861_v53 = vld [vmem:[%s1229_s1 + $0xf0] ss:$8 sps:$4 sm:$0xff]   ;;  %v897_v57 = vld [vmem:[%s1231_s3 + $0xb4] ss:$8 sps:$4 sm:$0xff]   ;;  %v900_v59 = vld [vmem:[%s1231_s3 + $0xc4] ss:$8 sps:$4 sm:$0xff]  }
  0x14   :  { %249 = vmatprep.subr.bf16.mxu0 %v829_v10  ;;  %v899_v58 = vld [vmem:[%s1231_s3 + $0xb0] ss:$8 sps:$4 sm:$0xff]   ;;  %v902_v60 = vld [vmem:[%s1231_s3 + $0xc0] ss:$8 sps:$4 sm:$0xff]   ;;  %v903_v61 = vld [vmem:[%s1231_s3 + $0xd4] ss:$8 sps:$4 sm:$0xff]  }
  0x15   :  { %493 = vmatpush1.bf16.msra.mxu1 %v875_v29  ;;  %v905_v62 = vld [vmem:[%s1231_s3 + $0xd0] ss:$8 sps:$4 sm:$0xff]   ;;  %v906_v63 = vld [vmem:[%s1231_s3 + $0xe4] ss:$8 sps:$4 sm:$0xff]   ;;  %v908_v0 = vld [vmem:[%s1231_s3 + $0xe0] ss:$8 sps:$4 sm:$0xff]  }
  0x16   :  { %494 = vmatprep.subr.bf16.mxu1 %v876_v30  ;;  %v909_v1 = vld [vmem:[%s1231_s3 + $0xf4] ss:$8 sps:$4 sm:$0xff]   ;;  %v911_v2 = vld [vmem:[%s1231_s3 + $0xf0] ss:$8 sps:$4 sm:$0xff]   ;;  %v912_v3 = vld [vmem:[%s1232_s5 + $0x40] sm:$0xff]   ;;  %v63_v17 = vshrl.u32 %v62_v16, 7 }
  0x17   :  { %250 = vmatpush1.bf16.msra.mxu0 %v831_v11  ;;  %v913_v4 = vld [vmem:[%s1232_s5] sm:$0xff]   ;;  %v914_v5 = vld [vmem:[%s1232_s5 + $0x48] sm:$0xff]   ;;  %v916_v7 = vld [vmem:[%s1232_s5 + $0x50] sm:$0xff]  }
  0x18   :  { %251 = vmatprep.subr.bf16.mxu0 %v832_v12  ;;  %v915_v6 = vld [vmem:[%s1232_s5 + $0x8] sm:$0xff]   ;;  %v917_v8 = vld [vmem:[%s1232_s5 + $0x10] sm:$0xff]   ;;  %v918_v9 = vld [vmem:[%s1232_s5 + $0x58] sm:$0xff]   ;;  %v64_v18 = vsub.s32 0, %v63_v17 }
  0x19   :  { %495 = vmatpush1.bf16.msra.mxu1 %v878_v33  ;;  %v919_v10 = vld [vmem:[%s1232_s5 + $0x18] sm:$0xff]   ;;  %v920_v11 = vld [vmem:[%s1232_s5 + $0x60] sm:$0xff]   ;;  %v923_v14 = vld [vmem:[%s1232_s5 + $0x28] sm:$0xff]  }
  0x1a   :  { %496 = vmatprep.subr.bf16.mxu1 %v879_v34  ;;  %v921_v12 = vld [vmem:[%s1232_s5 + $0x20] sm:$0xff]   ;;  %v924_v15 = vld [vmem:[%s1232_s5 + $0x70] sm:$0xff]   ;;  %v927_v33 = vld [vmem:[%s1232_s5 + $0x38] sm:$0xff]  }
  0x1b   :  { %252 = vmatpush1.bf16.msra.mxu0 %v834_v13  ;;  %v922_v13 = vld [vmem:[%s1232_s5 + $0x68] sm:$0xff]   ;;  %v314_v34 = vld [vmem:[%s1234_s4] sm:$0x3] }
  0x1c   :  { %253 = vmatprep.subr.bf16.mxu0 %v835_v19  ;;  %v60_v19 = vld [vmem:[%s1233_s2] sm:$0x3] }
  0x1d   :  { %497 = vmatpush1.bf16.msra.mxu1 %v881_v36  ;;  %v65_v21 = vrot.slane %v60_v19, %v64_v18 }
  0x1e   :  { %498 = vmatprep.subr.bf16.mxu1 %v882_v38 }
  0x1f   :  { %254 = vmatpush1.bf16.msra.mxu0 %v837_v20  ;;  %v68_v20 = vsub.s32 1, %v63_v17 }
  0x20   :  { %255 = vmatprep.subr.bf16.mxu0 %v838_v23 }
  0x21   :  { %499 = vmatpush1.bf16.msra.mxu1 %v884_v40  ;;  %v69_v22 = vrot.slane %v60_v19, %v68_v20  ;;  %v323_v36 = vrot.slane %v314_v34, %v68_v20 }
  0x22   :  { %500 = vmatprep.subr.bf16.mxu1 %v885_v42 }
  0x23   :  { %256 = vmatpush1.bf16.msra.mxu0 %v840_v24 }
  0x24   :  { %257 = vmatprep.subr.bf16.mxu0 %v841_v27 }
  0x25   :  { %501 = vmatpush1.bf16.msra.mxu1 %v887_v44 }
  0x26   :  { %502 = vmatprep.subr.bf16.mxu1 %v888_v46  ;;  %v775_v46 = vld [vmem:[%s1235_s6] ss:$0 sm:$0xff] }
  0x27   :  { %258 = vmatpush1.bf16.msra.mxu0 %v843_v28 }
  0x28   :  { %259 = vmatprep.subr.bf16.mxu0 %v844_v31  ;;  %v925_v31 = vld [vmem:[%s1232_s5 + $0x30] sm:$0xff]  }
  0x29   :  { %503 = vmatpush1.bf16.msra.mxu1 %v890_v48 }
  0x2a   :  { %504 = vmatprep.subr.bf16.mxu1 %v891_v50 }
  0x2b   :  { %260 = vmatpush1.bf16.msra.mxu0 %v846_v32  ;;  %v926_v32 = vld [vmem:[%s1232_s5 + $0x78] sm:$0xff]  }
  0x2c   :  { %261 = vmatprep.subr.bf16.mxu0 %v847_v35  ;;  %v319_v35 = vrot.slane %v314_v34, %v64_v18 }
  0x2d   :  { %505 = vmatpush1.bf16.msra.mxu1 %v893_v52 }
  0x2e   :  { %506 = vmatprep.subr.bf16.mxu1 %v894_v54 }
  0x2f   :  { %262 = vmatpush1.bf16.msra.mxu0 %v849_v37 }
  0x30   :  { %263 = vmatprep.subr.bf16.mxu0 %v850_v39 }
  0x31   :  { %507 = vmatpush1.bf16.msra.mxu1 %v896_v56 }
  0x32   :  { %508 = vmatprep.subr.bf16.mxu1 %v897_v57 }
  0x33   :  { %264 = vmatpush1.bf16.msra.mxu0 %v852_v41 }
  0x34   :  { %265 = vmatprep.subr.bf16.mxu0 %v853_v43 }
  0x35   :  { %509 = vmatpush1.bf16.msra.mxu1 %v899_v58 }
  0x36   :  { %510 = vmatprep.subr.bf16.mxu1 %v900_v59 }
  0x37   :  { %266 = vmatpush1.bf16.msra.mxu0 %v855_v45 }
  0x38   :  { %267 = vmatprep.subr.bf16.mxu0 %v856_v47 }
  0x39   :  { %511 = vmatpush1.bf16.msra.mxu1 %v902_v60 }
  0x3a   :  { %512 = vmatprep.subr.bf16.mxu1 %v903_v61 }
  0x3b   :  { %268 = vmatpush1.bf16.msra.mxu0 %v858_v49 }
  0x3c   :  { %269 = vmatprep.subr.bf16.mxu0 %v859_v51 }
  0x3d   :  { %513 = vmatpush1.bf16.msra.mxu1 %v905_v62 }
  0x3e   :  { %514 = vmatprep.subr.bf16.mxu1 %v906_v63 }
  0x3f   :  { %270 = vmatpush1.bf16.msra.mxu0 %v861_v53 }
  0x40   :  { %792 = vmatprep.subr.bf16.mxu0 %v912_v3 }
  0x41   :  { %515 = vmatpush1.bf16.msra.mxu1 %v908_v0 }
  0x42   :  { %272 = vmatmul.mubr.bf16.vlgmr.msra.gmra.mrb[0].mxu0 %v709_v55  ;;  %516 = vmatprep.subr.bf16.mxu1 %v909_v1 }
  0x43   :  { %793 = vmatpush3.bf16.msra.mxu0 %v913_v4 }
  0x44   :  { %794 = vmatprep.subr.bf16.mxu0 %v914_v5 }
  0x45   :  { %517 = vmatpush1.bf16.msra.mxu1 %v911_v2 }
  0x47   :  { %795 = vmatpush3.bf16.msra.mxu0 %v915_v6 }
  0x48   :  { %796 = vmatprep.subr.bf16.mxu0 %v916_v7 }
  0x4b   :  { %797 = vmatpush3.bf16.msra.mxu0 %v917_v8 }
  0x4c   :  { %798 = vmatprep.subr.bf16.mxu0 %v918_v9 }
  0x4f   :  { %799 = vmatpush3.bf16.msra.mxu0 %v919_v10 }
  0x50   :  { %800 = vmatprep.subr.bf16.mxu0 %v920_v11 }
  0x53   :  { %801 = vmatpush3.bf16.msra.mxu0 %v921_v12 }
  0x54   :  { %802 = vmatprep.subr.bf16.mxu0 %v922_v13 }
  0x57   :  { %803 = vmatpush3.bf16.msra.mxu0 %v923_v14 }
  0x58   :  { %804 = vmatprep.subr.bf16.mxu0 %v924_v15 }
  0x5b   :  { %805 = vmatpush3.bf16.msra.mxu0 %v925_v31 }
  0x5c   :  { %806 = vmatprep.subr.bf16.mxu0 %v926_v32 }
  0x5f   :  { %807 = vmatpush3.bf16.msra.mxu0 %v927_v33 }
 0x115   :  { %v273_v23 = vpop.f32.mrb[0].mxu0 }
 0x116   :  { %v274_v24 = vadd.f32 %v273_v23, %v65_v21  ;;  %v275_v25 = vpop.f32.mrb[1].mxu0 }
 0x117   :  { %v277_v26 = vpop.f32.mrb[2].mxu0  ;;  %v276_v27 = vadd.f32 %v275_v25, %v69_v22 }
 0x118   :  { %v278_v28 = vpop.f32.mrb[3].mxu0  ;;  %v280_v30 = vpack.c.bf16 %v274_v24, %v274_v24 }
 0x119   :  { %v281_v29 = vpack.c.bf16 %v276_v27, %v276_v27 }
 0x11b   :  { %518 = vmatprep.mubr.bf16.mxu1 %v281_v29 }
 0x11c   :  { %519 = vmatmul.mubr.bf16.vlgmr.msra.gmra.mrb[0].mxu1 %v280_v30 }
 0x1ef   :  { %v520_v37 = vpop.f32.mrb[0].mxu1 }
 0x1f0   :  { %v521_v38 = vadd.f32 %v520_v37, %v319_v35  ;;  %v522_v39 = vpop.f32.mrb[1].mxu1 }
 0x1f1   :  { %v523_v40 = vadd.f32 %v522_v39, %v323_v36  ;;  %v524_v41 = vpop.f32.mrb[2].mxu1 }
 0x1f2   :  { %v525_v42 = vpop.f32.mrb[3].mxu1  ;;  %v527_v44 = vpack.c.bf16 %v521_v38, %v521_v38 }
 0x1f3   :  { %v528_v43 = vpack.c.bf16 %v523_v40, %v523_v40 }
 0x1f5   :  { %696 = vmatprep.mubr.bf16.mxu0 %v528_v43 }
 0x1f6   :  { %697 = vmatmul.mubr.bf16.vlgmr.msra.gmra.mrb[4].mxu0 %v527_v44 }
 0x2c9   :  { %v808_v45 = vpop.f32.mrb[4].mxu0 }
 0x2ca   :  { %v809_v47 = vpop.f32.mrb[5].mxu0 }
 0x2cb   :  { %v810_v48 = vadd.f32 %v809_v47, %v808_v45  ;;  %v811_v49 = vpop.f32.mrb[6].mxu0 }
 0x2cc   :  { %v812_v50 = vpop.f32.mrb[7].mxu0 }
 0x2cd   :  { %v699_v51 = vadd.f32 %v810_v48, %v775_v46 }
 0x2cf   :  { %704 = vst [vmem:[%s1236_s7] sm:$0xff] %v699_v51 }

</bundles_post_ra>
